<compile_context>
chip_gen: v5e
topology: v5e:2x2
jax: 0.10.0
libtpu: 0.0.40
codegen_flags: <defaults>
</compile_context>

<pallas_src>
import functools
import math

import jax
import jax.numpy as jnp
from jax.experimental import pallas as pl
from jax.experimental.pallas import tpu as pltpu


def _classifier_kernel(at_ref, m_ref, h0_ref, nin_ref, nout_ref,
                       w1_ref, b1_ref, w2_ref, b2_ref, wc_ref, bc_ref,
                       out_ref,
                       acc_ref, xw_ref, h_ref,
                       *, tile_m, tile_k):
    l = pl.program_id(0)          # GraphConv layer (0 or 1)
    i = pl.program_id(1)          # dst-node tile
    k = pl.program_id(2)          # src-node tile
    num_l = pl.num_programs(0)
    num_i = pl.num_programs(1)
    num_k = pl.num_programs(2)

    layer_start = (i == 0) & (k == 0)

    # ---- per-layer prologue: xw = (norm_out * h_prev) @ W_l  (stored as bf16) ----
    @pl.when(layer_start & (l == 0))
    def _():
        # Layer 1 input features are the in-degrees (in_dim == 1), so the
        # "matmul" with W1 (1, H) is just an outer product -> do it on the VPU.
        x = nout_ref[...] * h0_ref[...]                       # (Np, 1)  f32
        xw_ref[...] = (x * w1_ref[...]).astype(xw_ref.dtype)  # (Np, H)  bf16

    @pl.when(layer_start & (l == 1))
    def _():
        x = nout_ref[...] * h_ref[...]                        # (Np, H)  f32
        xw_ref[...] = jnp.dot(
            x, w2_ref[...],
            preferred_element_type=jnp.float32).astype(xw_ref.dtype)

    # ---- streamed aggregation over src tiles: acc += A^T_tile @ xw_tile ----
    @pl.when(k == 0)
    def _():
        acc_ref[...] = jnp.zeros_like(acc_ref)

    col0 = pl.multiple_of(k * tile_k, tile_k)
    acc_ref[...] += jnp.dot(at_ref[...], xw_ref[pl.ds(col0, tile_k), :],
                            preferred_element_type=jnp.float32)

    # ---- per-dst-tile epilogue: in-norm, bias, ReLU ----
    @pl.when(k == num_k - 1)
    def _():
        row0 = pl.multiple_of(i * tile_m, tile_m)
        nin_tile = nin_ref[pl.ds(row0, tile_m), :]            # (tile_m, 1) f32
        sel = (l == 0).astype(jnp.float32)
        bias = sel * b1_ref[...] + (1.0 - sel) * b2_ref[...]  # (1, H)
        h_ref[pl.ds(row0, tile_m), :] = jnp.maximum(
            nin_tile * acc_ref[...] + bias, 0.0)

    # ---- mean_nodes + classifier: exactly once, at the very last grid step ----
    @pl.when((l == num_l - 1) & (i == num_i - 1) & (k == num_k - 1))
    def _():
        hg = jnp.dot(m_ref[...], h_ref[...],
                     preferred_element_type=jnp.float32)      # (B, H)
        out_ref[...] = jnp.dot(hg, wc_ref[...],
                               preferred_element_type=jnp.float32) + bc_ref[...]


def classifier_forward(A, M, w1, b1, w2, b2, wc, bc, *, tile_m=256, tile_k=512):
    """A: [N,N] adjacency (src->dst), M: [B,N] mean-readout matrix."""
    N = A.shape[0]
    B = M.shape[0]
    H = w1.shape[1]
    C = wc.shape[1]
    assert tile_m % 8 == 0 and tile_k % 128 == 0

    step = math.lcm(tile_m, tile_k)
    npad = ((N + step - 1) // step) * step

    A_p = jnp.zeros((npad, npad), jnp.float32).at[:N, :N].set(A.astype(jnp.float32))
    M_p = jnp.zeros((B, npad), jnp.float32).at[:, :N].set(M.astype(jnp.float32))

    # Graph-structure constants via reductions (never on the MXU).
    deg_out = jnp.sum(A_p, axis=1, keepdims=True)             # (Np, 1) out-degree
    deg_in = jnp.sum(A_p, axis=0)[:, None]                    # (Np, 1) in-degree
    norm_out = jax.lax.rsqrt(jnp.maximum(deg_out, 1.0))       # D_out^-1/2
    norm_in = jax.lax.rsqrt(jnp.maximum(deg_in, 1.0))         # D_in^-1/2
    h0 = deg_in                                               # initial node feature

    # Aggregation operand: A^T (each dst gathers from its src).  0/1 -> bf16 lossless.
    AT = A_p.T.astype(jnp.bfloat16)

    grid = (2, npad // tile_m, npad // tile_k)
    const = lambda l, i, k: (0, 0)
    kernel = functools.partial(_classifier_kernel, tile_m=tile_m, tile_k=tile_k)

    return pl.pallas_call(
        kernel,
        out_shape=jax.ShapeDtypeStruct((B, C), jnp.float32),
        grid_spec=pltpu.PrefetchScalarGridSpec(
            num_scalar_prefetch=0,
            grid=grid,
            in_specs=[
                pl.BlockSpec((tile_m, tile_k), lambda l, i, k: (i, k)),  # A^T tiles (streamed)
                pl.BlockSpec((B, npad), const),                          # M       (resident)
                pl.BlockSpec((npad, 1), const),                          # h0 = in-degrees
                pl.BlockSpec((npad, 1), const),                          # norm_in
                pl.BlockSpec((npad, 1), const),                          # norm_out
                pl.BlockSpec((1, H), const),                             # W1
                pl.BlockSpec((1, H), const),                             # b1
                pl.BlockSpec((H, H), const),                             # W2
                pl.BlockSpec((1, H), const),                             # b2
                pl.BlockSpec((H, C), const),                             # Wc
                pl.BlockSpec((1, C), const),                             # bc
            ],
            out_specs=pl.BlockSpec((B, C), const),
            scratch_shapes=[
                pltpu.VMEM((tile_m, H), jnp.float32),   # per-dst-tile aggregation accumulator
                pltpu.VMEM((npad, H), jnp.bfloat16),    # (norm_out * h_prev) @ W_l
                pltpu.VMEM((npad, H), jnp.float32),     # node features h (layer output)
            ],
        ),
        compiler_params=pltpu.CompilerParams(
            # TODO(synk): shard the dst-tile axis across v7x's two TensorCores;
            # the per-layer barrier (xw prologue / final readout) keeps all axes
            # "arbitrary" in this single-core-safe version.
            dimension_semantics=("arbitrary", "arbitrary", "arbitrary"),
            vmem_limit_bytes=32 * 1024 * 1024,
        ),
    )(AT, M_p, h0, norm_in, norm_out, w1, b1, w2, b2, wc, bc)


def reference_forward_f32(A, M, w1, b1, w2, b2, wc, bc):
    """Pure-f32 JAX reference matching the PyTorch/DGL module."""
    AT = A.T
    deg_out = A.sum(axis=1, keepdims=True)
    deg_in = A.sum(axis=0)[:, None]
    norm_out = jax.lax.rsqrt(jnp.maximum(deg_out, 1.0))
    norm_in = jax.lax.rsqrt(jnp.maximum(deg_in, 1.0))
    h = deg_in
    for w, b in ((w1, b1), (w2, b2)):
        h = jnp.maximum(norm_in * (AT @ ((norm_out * h) @ w)) + b, 0.0)
    hg = M @ h
    return hg @ wc + bc


def reference_forward_mixed(A, M, w1, b1, w2, b2, wc, bc):
    """Reference mimicking the kernel's mixed precision (bf16 MXU operands,
    f32 accumulation) so it can be compared at tight tolerance."""
    ATb = A.T.astype(jnp.bfloat16)
    deg_out = A.sum(axis=1, keepdims=True)
    deg_in = A.sum(axis=0)[:, None]
    norm_out = jax.lax.rsqrt(jnp.maximum(deg_out, 1.0))
    norm_in = jax.lax.rsqrt(jnp.maximum(deg_in, 1.0))

    xw1 = ((norm_out * deg_in) * w1).astype(jnp.bfloat16)
    agg1 = jnp.dot(ATb, xw1, preferred_element_type=jnp.float32)
    h1 = jnp.maximum(norm_in * agg1 + b1, 0.0)

    xw2 = jnp.dot(norm_out * h1, w2,
                  precision=jax.lax.Precision.HIGHEST).astype(jnp.bfloat16)
    agg2 = jnp.dot(ATb, xw2, preferred_element_type=jnp.float32)
    h2 = jnp.maximum(norm_in * agg2 + b2, 0.0)

    hg = jnp.dot(M, h2, precision=jax.lax.Precision.HIGHEST)
    return jnp.dot(hg, wc, precision=jax.lax.Precision.HIGHEST) + bc


if __name__ == "__main__":
    B = 2            # graphs in the batch
    npg = 80         # nodes per graph  -> N = 160, padded to 256 -> 2x2 A^T tiles
    N = B * npg
    in_dim = 1       # GraphConv input = in_degrees
    hidden = 32
    n_classes = 4

    key = jax.random.PRNGKey(0)
    k_adj, k_w1, k_b1, k_w2, k_b2, k_wc, k_bc = jax.random.split(key, 7)

    # Block-diagonal adjacency: edges only inside each graph (deterministic).
    A = jnp.zeros((N, N), jnp.float32)
    for b in range(B):
        kb = jax.random.fold_in(k_adj, b)
        blk = (jax.random.uniform(kb, (npg, npg)) < 0.3).astype(jnp.float32)
        A = A.at[b * npg:(b + 1) * npg, b * npg:(b + 1) * npg].set(blk)

    # dgl.mean_nodes readout matrix.
    M = jnp.zeros((B, N), jnp.float32)
    for b in range(B):
        M = M.at[b, b * npg:(b + 1) * npg].set(1.0 / npg)

    # Deterministic parameters.
    w1 = 0.3 * jax.random.normal(k_w1, (in_dim, hidden), jnp.float32)
    b1 = 0.05 * jax.random.normal(k_b1, (1, hidden), jnp.float32)
    w2 = 0.15 * jax.random.normal(k_w2, (hidden, hidden), jnp.float32)
    b2 = 0.05 * jax.random.normal(k_b2, (1, hidden), jnp.float32)
    wc = 0.2 * jax.random.normal(k_wc, (hidden, n_classes), jnp.float32)
    bc = 0.05 * jax.random.normal(k_bc, (1, n_classes), jnp.float32)

    out = classifier_forward(A, M, w1, b1, w2, b2, wc, bc,
                             tile_m=128, tile_k=128)
    out = jax.block_until_ready(out)
    assert out.shape == (B, n_classes)

    # Tight check against a reference with identical mixed-precision math.
    ref_mixed = reference_forward_mixed(A, M, w1, b1, w2, b2, wc, bc)
    assert jnp.allclose(out, ref_mixed, atol=1e-3, rtol=1e-3), (out, ref_mixed)

    # Loose sanity check against the pure-f32 module semantics.
    ref_f32 = reference_forward_f32(A, M, w1, b1, w2, b2, wc, bc)
    err = float(jnp.max(jnp.abs(out - ref_f32)))
    assert err <= 0.05 * (1.0 + float(jnp.max(jnp.abs(ref_f32)))), (out, ref_f32, err)

    print("KERNEL_OK")
</pallas_src>

<mosaic_0001>
module attributes {stable_mosaic.version = 11 : i64} {
  func.func @_classifier_kernel(%arg0: i32, %arg1: i32, %arg2: i32, %arg3: memref<128x128xbf16, #tpu.memory_space<vmem>>, %arg4: memref<2x256xf32, #tpu.memory_space<vmem>>, %arg5: memref<256x1xf32, #tpu.memory_space<vmem>>, %arg6: memref<256x1xf32, #tpu.memory_space<vmem>>, %arg7: memref<256x1xf32, #tpu.memory_space<vmem>>, %arg8: memref<1x32xf32, #tpu.memory_space<vmem>>, %arg9: memref<1x32xf32, #tpu.memory_space<vmem>>, %arg10: memref<32x32xf32, #tpu.memory_space<vmem>>, %arg11: memref<1x32xf32, #tpu.memory_space<vmem>>, %arg12: memref<32x4xf32, #tpu.memory_space<vmem>>, %arg13: memref<1x4xf32, #tpu.memory_space<vmem>>, %arg14: memref<2x4xf32, #tpu.memory_space<vmem>>, %arg15: memref<128x32xf32, #tpu.memory_space<vmem>>, %arg16: memref<256x32xbf16, #tpu.memory_space<vmem>>, %arg17: memref<256x32xf32, #tpu.memory_space<vmem>>) attributes {dimension_semantics = [#tpu.dimension_semantics<arbitrary>, #tpu.dimension_semantics<arbitrary>, #tpu.dimension_semantics<arbitrary>], iteration_bounds = array<i64: 2, 2, 2>, scalar_prefetch = 0 : i64, scratch_operands = 3 : i64, tpu.core_type = #tpu.core_type<tc>, window_params = [{transform_indices = @transform_0, window_bounds = array<i64: 128, 128>}, {pipeline_mode = #tpu.pipeline_mode<synchronous>, transform_indices = @transform_1, window_bounds = array<i64: 2, 256>}, {pipeline_mode = #tpu.pipeline_mode<synchronous>, transform_indices = @transform_2, window_bounds = array<i64: 256, 1>}, {pipeline_mode = #tpu.pipeline_mode<synchronous>, transform_indices = @transform_3, window_bounds = array<i64: 256, 1>}, {pipeline_mode = #tpu.pipeline_mode<synchronous>, transform_indices = @transform_4, window_bounds = array<i64: 256, 1>}, {pipeline_mode = #tpu.pipeline_mode<synchronous>, transform_indices = @transform_5, window_bounds = array<i64: 1, 32>}, {pipeline_mode = #tpu.pipeline_mode<synchronous>, transform_indices = @transform_6, window_bounds = array<i64: 1, 32>}, {pipeline_mode = #tpu.pipeline_mode<synchronous>, transform_indices = @transform_7, window_bounds = array<i64: 32, 32>}, {pipeline_mode = #tpu.pipeline_mode<synchronous>, transform_indices = @transform_8, window_bounds = array<i64: 1, 32>}, {pipeline_mode = #tpu.pipeline_mode<synchronous>, transform_indices = @transform_9, window_bounds = array<i64: 32, 4>}, {pipeline_mode = #tpu.pipeline_mode<synchronous>, transform_indices = @transform_10, window_bounds = array<i64: 1, 4>}, {pipeline_mode = #tpu.pipeline_mode<synchronous>, transform_indices = @transform_11, window_bounds = array<i64: 2, 4>}]} {
    %c0_i32 = arith.constant 0 : i32
    %0 = arith.cmpi eq, %arg1, %c0_i32 : i32
    %c0_i32_0 = arith.constant 0 : i32
    %1 = arith.cmpi eq, %arg2, %c0_i32_0 : i32
    %2 = arith.andi %0, %1 : i1
    %c0_i32_1 = arith.constant 0 : i32
    %3 = arith.cmpi eq, %arg0, %c0_i32_1 : i32
    %4 = arith.andi %2, %3 : i1
    %5 = arith.extui %4 : i1 to i32
    %c0_i32_2 = arith.constant 0 : i32
    %6 = arith.cmpi ne, %5, %c0_i32_2 : i32
    scf.if %6 {
      %c0_18 = arith.constant 0 : index
      %c0_19 = arith.constant 0 : index
      %33 = vector.load %arg7[%c0_18, %c0_19] : memref<256x1xf32, #tpu.memory_space<vmem>>, vector<256x1xf32>
      %c0_20 = arith.constant 0 : index
      %c0_21 = arith.constant 0 : index
      %34 = vector.load %arg5[%c0_20, %c0_21] : memref<256x1xf32, #tpu.memory_space<vmem>>, vector<256x1xf32>
      %35 = arith.mulf %33, %34 : vector<256x1xf32>
      %c0_22 = arith.constant 0 : index
      %c0_23 = arith.constant 0 : index
      %36 = vector.load %arg8[%c0_22, %c0_23] : memref<1x32xf32, #tpu.memory_space<vmem>>, vector<1x32xf32>
      %37 = vector.broadcast %35 : vector<256x1xf32> to vector<256x32xf32>
      %38 = vector.broadcast %36 : vector<1x32xf32> to vector<256x32xf32>
      %39 = arith.mulf %37, %38 : vector<256x32xf32>
      %40 = arith.truncf %39 : vector<256x32xf32> to vector<256x32xbf16>
      %c0_24 = arith.constant 0 : index
      %c0_25 = arith.constant 0 : index
      %41 = vector.load %arg16[%c0_24, %c0_25] : memref<256x32xbf16, #tpu.memory_space<vmem>>, vector<256x32xbf16>
      tpu.vector_store %arg16[%c0_24, %c0_25], %40 {strides = array<i32>} : memref<256x32xbf16, #tpu.memory_space<vmem>>, vector<256x32xbf16>,
    } else {
    }
    %c1_i32 = arith.constant 1 : i32
    %7 = arith.cmpi eq, %arg0, %c1_i32 : i32
    %8 = arith.andi %2, %7 : i1
    %9 = arith.extui %8 : i1 to i32
    %c0_i32_3 = arith.constant 0 : i32
    %10 = arith.cmpi ne, %9, %c0_i32_3 : i32
    scf.if %10 {
      %c0_18 = arith.constant 0 : index
      %c0_19 = arith.constant 0 : index
      %33 = vector.load %arg7[%c0_18, %c0_19] : memref<256x1xf32, #tpu.memory_space<vmem>>, vector<256x1xf32>
      %c0_20 = arith.constant 0 : index
      %c0_21 = arith.constant 0 : index
      %34 = vector.load %arg17[%c0_20, %c0_21] : memref<256x32xf32, #tpu.memory_space<vmem>>, vector<256x32xf32>
      %35 = vector.broadcast %33 : vector<256x1xf32> to vector<256x32xf32>
      %36 = arith.mulf %35, %34 : vector<256x32xf32>
      %c0_22 = arith.constant 0 : index
      %c0_23 = arith.constant 0 : index
      %37 = vector.load %arg10[%c0_22, %c0_23] : memref<32x32xf32, #tpu.memory_space<vmem>>, vector<32x32xf32>
      %cst_24 = arith.constant dense<0.000000e+00> : vector<256x32xf32>
      %38 = tpu.matmul %36, %37, %cst_24 {dimension_numbers = #tpu.dot_dimension_numbers<[1], [0], [0], [1], [0, 0, 1, 1], [], []>} : vector<256x32xf32>, vector<32x32xf32>, vector<256x32xf32> -> vector<256x32xf32>
      %39 = arith.truncf %38 : vector<256x32xf32> to vector<256x32xbf16>
      %c0_25 = arith.constant 0 : index
      %c0_26 = arith.constant 0 : index
      %40 = vector.load %arg16[%c0_25, %c0_26] : memref<256x32xbf16, #tpu.memory_space<vmem>>, vector<256x32xbf16>
      tpu.vector_store %arg16[%c0_25, %c0_26], %39 {strides = array<i32>} : memref<256x32xbf16, #tpu.memory_space<vmem>>, vector<256x32xbf16>,
    } else {
    }
    %c0_i32_4 = arith.constant 0 : i32
    %11 = arith.cmpi eq, %arg2, %c0_i32_4 : i32
    %12 = arith.extui %11 : i1 to i32
    %c0_i32_5 = arith.constant 0 : i32
    %13 = arith.cmpi ne, %12, %c0_i32_5 : i32
    scf.if %13 {
      %cst_18 = arith.constant 0.000000e+00 : f32
      %33 = vector.broadcast %cst_18 : f32 to vector<128x32xf32>
      %c0_19 = arith.constant 0 : index
      %c0_20 = arith.constant 0 : index
      %34 = vector.load %arg15[%c0_19, %c0_20] : memref<128x32xf32, #tpu.memory_space<vmem>>, vector<128x32xf32>
      tpu.vector_store %arg15[%c0_19, %c0_20], %33 {strides = array<i32>} : memref<128x32xf32, #tpu.memory_space<vmem>>, vector<128x32xf32>,
    } else {
    }
    %c128_i32 = arith.constant 128 : i32
    %14 = arith.muli %arg2, %c128_i32 : i32
    %15 = tpu.assume_multiple %14, 128 : i32
    %c0 = arith.constant 0 : index
    %c0_6 = arith.constant 0 : index
    %16 = vector.load %arg15[%c0, %c0_6] : memref<128x32xf32, #tpu.memory_space<vmem>>, vector<128x32xf32>
    %c0_7 = arith.constant 0 : index
    %c0_8 = arith.constant 0 : index
    %17 = vector.load %arg3[%c0_7, %c0_8] : memref<128x128xbf16, #tpu.memory_space<vmem>>, vector<128x128xbf16>
    %18 = arith.index_cast %15 : i32 to index
    %c0_9 = arith.constant 0 : index
    %19 = vector.load %arg16[%18, %c0_9] : memref<256x32xbf16, #tpu.memory_space<vmem>>, vector<128x32xbf16>
    %cst = arith.constant dense<0.000000e+00> : vector<128x32xf32>
    %20 = tpu.matmul %17, %19, %cst {dimension_numbers = #tpu.dot_dimension_numbers<[1], [0], [0], [1], [0, 0, 1, 1], [], []>} : vector<128x128xbf16>, vector<128x32xbf16>, vector<128x32xf32> -> vector<128x32xf32>
    %21 = arith.addf %16, %20 : vector<128x32xf32>
    %c0_10 = arith.constant 0 : index
    %c0_11 = arith.constant 0 : index
    %22 = vector.load %arg15[%c0_10, %c0_11] : memref<128x32xf32, #tpu.memory_space<vmem>>, vector<128x32xf32>
    tpu.vector_store %arg15[%c0_10, %c0_11], %21 {strides = array<i32>} : memref<128x32xf32, #tpu.memory_space<vmem>>, vector<128x32xf32>,
    %c1_i32_12 = arith.constant 1 : i32
    %23 = arith.cmpi eq, %arg2, %c1_i32_12 : i32
    %24 = arith.extui %23 : i1 to i32
    %c0_i32_13 = arith.constant 0 : i32
    %25 = arith.cmpi ne, %24, %c0_i32_13 : i32
    scf.if %25 {
      %c128_i32_18 = arith.constant 128 : i32
      %33 = arith.muli %arg1, %c128_i32_18 : i32
      %34 = tpu.assume_multiple %33, 128 : i32
      %35 = arith.index_cast %34 : i32 to index
      %c0_19 = arith.constant 0 : index
      %36 = vector.load %arg6[%35, %c0_19] : memref<256x1xf32, #tpu.memory_space<vmem>>, vector<128x1xf32>
      %c0_i32_20 = arith.constant 0 : i32
      %37 = arith.cmpi eq, %arg0, %c0_i32_20 : i32
      %38 = arith.extui %37 : i1 to i32
      %39 = arith.sitofp %38 : i32 to f32
      %c0_21 = arith.constant 0 : index
      %c0_22 = arith.constant 0 : index
      %40 = vector.load %arg9[%c0_21, %c0_22] : memref<1x32xf32, #tpu.memory_space<vmem>>, vector<1x32xf32>
      %41 = vector.broadcast %39 : f32 to vector<1x32xf32>
      %42 = arith.mulf %41, %40 : vector<1x32xf32>
      %cst_23 = arith.constant 1.000000e+00 : f32
      %43 = arith.subf %cst_23, %39 : f32
      %c0_24 = arith.constant 0 : index
      %c0_25 = arith.constant 0 : index
      %44 = vector.load %arg11[%c0_24, %c0_25] : memref<1x32xf32, #tpu.memory_space<vmem>>, vector<1x32xf32>
      %45 = vector.broadcast %43 : f32 to vector<1x32xf32>
      %46 = arith.mulf %45, %44 : vector<1x32xf32>
      %47 = arith.addf %42, %46 : vector<1x32xf32>
      %c0_26 = arith.constant 0 : index
      %c0_27 = arith.constant 0 : index
      %48 = vector.load %arg15[%c0_26, %c0_27] : memref<128x32xf32, #tpu.memory_space<vmem>>, vector<128x32xf32>
      %49 = vector.broadcast %36 : vector<128x1xf32> to vector<128x32xf32>
      %50 = arith.mulf %49, %48 : vector<128x32xf32>
      %51 = vector.broadcast %47 : vector<1x32xf32> to vector<128x32xf32>
      %52 = arith.addf %50, %51 : vector<128x32xf32>
      %cst_28 = arith.constant 0.000000e+00 : f32
      %53 = vector.broadcast %cst_28 : f32 to vector<128x32xf32>
      %54 = arith.maximumf %52, %53 : vector<128x32xf32>
      %55 = arith.index_cast %34 : i32 to index
      %c0_29 = arith.constant 0 : index
      %56 = vector.load %arg17[%55, %c0_29] : memref<256x32xf32, #tpu.memory_space<vmem>>, vector<128x32xf32>
      tpu.vector_store %arg17[%55, %c0_29], %54 {strides = array<i32>} : memref<256x32xf32, #tpu.memory_space<vmem>>, vector<128x32xf32>,
    } else {
    }
    %c1_i32_14 = arith.constant 1 : i32
    %26 = arith.cmpi eq, %arg0, %c1_i32_14 : i32
    %c1_i32_15 = arith.constant 1 : i32
    %27 = arith.cmpi eq, %arg1, %c1_i32_15 : i32
    %28 = arith.andi %26, %27 : i1
    %c1_i32_16 = arith.constant 1 : i32
    %29 = arith.cmpi eq, %arg2, %c1_i32_16 : i32
    %30 = arith.andi %28, %29 : i1
    %31 = arith.extui %30 : i1 to i32
    %c0_i32_17 = arith.constant 0 : i32
    %32 = arith.cmpi ne, %31, %c0_i32_17 : i32
    scf.if %32 {
      %c0_18 = arith.constant 0 : index
      %c0_19 = arith.constant 0 : index
      %33 = vector.load %arg4[%c0_18, %c0_19] : memref<2x256xf32, #tpu.memory_space<vmem>>, vector<2x256xf32>
      %c0_20 = arith.constant 0 : index
      %c0_21 = arith.constant 0 : index
      %34 = vector.load %arg17[%c0_20, %c0_21] : memref<256x32xf32, #tpu.memory_space<vmem>>, vector<256x32xf32>
      %cst_22 = arith.constant dense<0.000000e+00> : vector<2x32xf32>
      %35 = tpu.matmul %33, %34, %cst_22 {dimension_numbers = #tpu.dot_dimension_numbers<[1], [0], [0], [1], [0, 0, 1, 1], [], []>} : vector<2x256xf32>, vector<256x32xf32>, vector<2x32xf32> -> vector<2x32xf32>
      %c0_23 = arith.constant 0 : index
      %c0_24 = arith.constant 0 : index
      %36 = vector.load %arg12[%c0_23, %c0_24] : memref<32x4xf32, #tpu.memory_space<vmem>>, vector<32x4xf32>
      %cst_25 = arith.constant dense<0.000000e+00> : vector<2x4xf32>
      %37 = tpu.matmul %35, %36, %cst_25 {dimension_numbers = #tpu.dot_dimension_numbers<[1], [0], [0], [1], [0, 0, 1, 1], [], []>} : vector<2x32xf32>, vector<32x4xf32>, vector<2x4xf32> -> vector<2x4xf32>
      %c0_26 = arith.constant 0 : index
      %c0_27 = arith.constant 0 : index
      %38 = vector.load %arg13[%c0_26, %c0_27] : memref<1x4xf32, #tpu.memory_space<vmem>>, vector<1x4xf32>
      %39 = vector.broadcast %38 : vector<1x4xf32> to vector<2x4xf32>
      %40 = arith.addf %37, %39 : vector<2x4xf32>
      %c0_28 = arith.constant 0 : index
      %c0_29 = arith.constant 0 : index
      %41 = vector.load %arg14[%c0_28, %c0_29] : memref<2x4xf32, #tpu.memory_space<vmem>>, vector<2x4xf32>
      tpu.vector_store %arg14[%c0_28, %c0_29], %40 {strides = array<i32>} : memref<2x4xf32, #tpu.memory_space<vmem>>, vector<2x4xf32>,
    } else {
    }
    return
  }
  func.func @transform_0(%arg0: i32, %arg1: i32, %arg2: i32) -> (i32, i32) {
    %c0_i32 = arith.constant 0 : i32
    return %arg1, %arg2 : i32, i32
  }
  func.func @transform_1(%arg0: i32, %arg1: i32, %arg2: i32) -> (i32, i32) {
    %c0_i32 = arith.constant 0 : i32
    %c0_i32_0 = arith.constant 0 : i32
    %c0_i32_1 = arith.constant 0 : i32
    return %c0_i32, %c0_i32_0 : i32, i32
  }
  func.func @transform_2(%arg0: i32, %arg1: i32, %arg2: i32) -> (i32, i32) {
    %c0_i32 = arith.constant 0 : i32
    %c0_i32_0 = arith.constant 0 : i32
    %c0_i32_1 = arith.constant 0 : i32
    return %c0_i32, %c0_i32_0 : i32, i32
  }
  func.func @transform_3(%arg0: i32, %arg1: i32, %arg2: i32) -> (i32, i32) {
    %c0_i32 = arith.constant 0 : i32
    %c0_i32_0 = arith.constant 0 : i32
    %c0_i32_1 = arith.constant 0 : i32
    return %c0_i32, %c0_i32_0 : i32, i32
  }
  func.func @transform_4(%arg0: i32, %arg1: i32, %arg2: i32) -> (i32, i32) {
    %c0_i32 = arith.constant 0 : i32
    %c0_i32_0 = arith.constant 0 : i32
    %c0_i32_1 = arith.constant 0 : i32
    return %c0_i32, %c0_i32_0 : i32, i32
  }
  func.func @transform_5(%arg0: i32, %arg1: i32, %arg2: i32) -> (i32, i32) {
    %c0_i32 = arith.constant 0 : i32
    %c0_i32_0 = arith.constant 0 : i32
    %c0_i32_1 = arith.constant 0 : i32
    return %c0_i32, %c0_i32_0 : i32, i32
  }
  func.func @transform_6(%arg0: i32, %arg1: i32, %arg2: i32) -> (i32, i32) {
    %c0_i32 = arith.constant 0 : i32
    %c0_i32_0 = arith.constant 0 : i32
    %c0_i32_1 = arith.constant 0 : i32
    return %c0_i32, %c0_i32_0 : i32, i32
  }
  func.func @transform_7(%arg0: i32, %arg1: i32, %arg2: i32) -> (i32, i32) {
    %c0_i32 = arith.constant 0 : i32
    %c0_i32_0 = arith.constant 0 : i32
    %c0_i32_1 = arith.constant 0 : i32
    return %c0_i32, %c0_i32_0 : i32, i32
  }
  func.func @transform_8(%arg0: i32, %arg1: i32, %arg2: i32) -> (i32, i32) {
    %c0_i32 = arith.constant 0 : i32
    %c0_i32_0 = arith.constant 0 : i32
    %c0_i32_1 = arith.constant 0 : i32
    return %c0_i32, %c0_i32_0 : i32, i32
  }
  func.func @transform_9(%arg0: i32, %arg1: i32, %arg2: i32) -> (i32, i32) {
    %c0_i32 = arith.constant 0 : i32
    %c0_i32_0 = arith.constant 0 : i32
    %c0_i32_1 = arith.constant 0 : i32
    return %c0_i32, %c0_i32_0 : i32, i32
  }
  func.func @transform_10(%arg0: i32, %arg1: i32, %arg2: i32) -> (i32, i32) {
    %c0_i32 = arith.constant 0 : i32
    %c0_i32_0 = arith.constant 0 : i32
    %c0_i32_1 = arith.constant 0 : i32
    return %c0_i32, %c0_i32_0 : i32, i32
  }
  func.func @transform_11(%arg0: i32, %arg1: i32, %arg2: i32) -> (i32, i32) {
    %c0_i32 = arith.constant 0 : i32
    %c0_i32_0 = arith.constant 0 : i32
    %c0_i32_1 = arith.constant 0 : i32
    return %c0_i32, %c0_i32_0 : i32, i32
  }
}

</mosaic_0001>

<bundles_post_ra>
// kernel: tpu_custom_call.1
= control target key start
LH: loop header
LB: loop body
LE: loop exit
PB: predicated region body
PF: predicated region fallthrough
CT: control target
= control target key end

     0   :  { %s3231_s0 = inlined_call_operand.vmem [shape: bf16[256,256], index: 0, kind: input, shape index: {}]   ;;  %s3232_s1 = inlined_call_operand.vmem [shape: f32[2,256], index: 1, kind: input, shape index: {}]   ;;  %s3233_s2 = inlined_call_operand.vmem [shape: f32[256,1], index: 2, kind: input, shape index: {}]   ;;  %s3234_s3 = inlined_call_operand.vmem [shape: f32[256,1], index: 3, kind: input, shape index: {}]   ;;  %s3235_s4 = inlined_call_operand.vmem [shape: f32[256,1], index: 4, kind: input, shape index: {}]   ;;  %s3236_s5 = inlined_call_operand.vmem [shape: f32[1,32], index: 5, kind: input, shape index: {}]   ;;  %s3237_s6 = inlined_call_operand.vmem [shape: f32[1,32], index: 6, kind: input, shape index: {}]   ;;  %s3238_s7 = inlined_call_operand.vmem [shape: f32[32,32], index: 7, kind: input, shape index: {}]   ;;  %s3239_s8 = inlined_call_operand.vmem [shape: f32[1,32], index: 8, kind: input, shape index: {}]   ;;  %s3240_s9 = inlined_call_operand.vmem [shape: f32[32,4], index: 9, kind: input, shape index: {}]   ;;  %s3241_s10 = inlined_call_operand.vmem [shape: f32[1,4], index: 10, kind: input, shape index: {}]   ;;  %s3242_s11 = inlined_call_operand.hbm [shape: f32[2,4], index: 11, kind: output, shape index: {}]  }
   0x1   :  { %3246 = sst [smem:[#allocation13_spill]] %s3231_s0 }
   0x2   :  { %3247 = sst [smem:[#allocation14_spill]] %s3241_s10 }
   0x3   :  { %3248 = sst [smem:[#allocation15_spill]] %s3242_s11 }
   0x4   :  { %16 = vsyncpa [#allocation7], 0  ;;  %s2484_s17 = smov 0   ;;  %s2486_s18 = smov 0  }
   0x5   :  { %s2488_s19 = smov 0   ;;  %s2490_s20 = smov 0  }
   0x6   :  { %s2492_s21 = smov 0   ;;  %s2494_s22 = smov 0  }
   0x7   :  { %s2496_s23 = smov 0   ;;  %s2498_s24 = smov 0  }
   0x8   :  { %s2500_s25 = smov 0  }
   0x9 LB: > { %3249 = sst [smem:[#allocation9_spill]] %s2413_s24  ;;  %s34_s27 = sadd.s32 1, %s2405_s22  ;;  %s2417_s25 = sphi %s2500_s25, %s22_s25   ;;  %s2413_s24 = sphi %s2498_s24, %s3261_s24   ;;  %s2409_s23 = sphi %s2496_s23, %s3267_s23   ;;  %s2405_s22 = sphi %s2494_s22, %s3266_s22   ;;  %s2401_s21 = sphi %s2492_s21, %s3258_s21   ;;  %s2397_s20 = sphi %s2490_s20, %s3265_s20   ;;  %s2393_s19 = sphi %s2488_s19, %s3264_s19   ;;  %s2389_s18 = sphi %s2486_s18, %s3263_s18   ;;  %s2385_s17 = sphi %s2484_s17, %s3262_s17  }
   0xa   : > { %p35_p0 = scmp.ge.s32.totalorder %s34_s27, 2  ;;  %s37_s28 = sadd.s32 1, %s2409_s23 }
   0xb   : > { %s41_s29 = sadd.s32 1, %s2413_s24  ;;  %p57_p1 = scmp.ne.s32.totalorder %s2389_s18, %s2385_s17 }
   0xc   : > { %s3269_s27 = smov (%p35_p0, %s34_s27), 0  ;;  %s3271_s28 = smov (!%p35_p0, %s37_s28), %s2409_s23 }
   0xd   : > { %3250 = sst [smem:[#allocation10_spill]] %s3269_s27  ;;  %p39_p2 = scmp.ge.s32.totalorder %s3271_s28, 2 }
   0xe   : > { %p58_p3 = scmp.eq.s32.totalorder %s2417_s25, 0  ;;  %s46_s30 = ssub.s32 %s2405_s22, %s3269_s27 }
   0xf   : > { %s50_s12 = sadd.s32 1, %s2389_s18  ;;  %s3273_s28 = smov (%p39_p2, %s3271_s28), 0 }
  0x10   : > { %3251 = sst [smem:[#allocation11_spill]] %s3273_s28  ;;  %s3275_s29 = smov (!%p39_p2, %s41_s29), %s2413_s24 }
  0x11   : > { %s45_s13 = ssub.s32 %s2409_s23, %s3273_s28  ;;  %p59_p4 = por %p58_p3, %p57_p1 }
  0x12   : > { %p43_p5 = scmp.ge.s32.totalorder %s3275_s29, 2  ;;  %s47_s14 = sor.u32 %s46_s30, %s45_s13 }
  0x13   : > { %p48_p6 = scmp.eq.s32.totalorder %s47_s14, 0  ;;  %p2055_p7 = scmp.ge.s32.totalorder %s2417_s25, 8 }
  0x14   : > { %s3277_s29 = smov (%p43_p5, %s3275_s29), 0 }
  0x15   : > { %3252 = sst [smem:[#allocation12_spill]] %s3277_s29  ;;  %344 = sbr.rel (%p2055_p7) target bundleno = 52 (0x34), region = 56 }
  0x16   : > { %s2550_s15 = scalar_select %p48_p6, %s2389_s18, %s50_s12  }
  0x1a   : > { %347 = sbr.rel (!%p59_p4) target bundleno = 52 (0x34), region = 60  ;;  %s349_s16 = sand.u32 (%p59_p4), 1, %s2389_s18  }
  0x1b   : > { %s2168_s26 = sshll.u32 (%p59_p4), %s2409_s23, 5  ;;  %s2056_s27 = sshll.u32 (%p59_p4), %s349_s16, 6 }
  0x1c   : > { %s354_s24 = sadd.s32 (%p59_p4), %s2405_s22, %s2168_s26  ;;  %s3253_s0 = sld [smem:[#allocation13_spill]] (%p59_p4) }
  0x1d   : > { %s2059_s28 = sshll.u32 (%p59_p4), %s354_s24, 2  ;;  %s351_s26 = scalar_lea.vmem (%p59_p4), [#allocation5], %s2056_s27 }
  0x22   : > { %s2559_s30 = scalar_lea.vmem %s3253_s0, %s2059_s28 }
  0x23   : > { %v373_v0 = vld [vmem:[%s2559_s30] sm:$0xf]  ;;  %v375_v1 = vld [vmem:[%s2559_s30 + $0x8] sm:$0xf]  ;;  %v377_v2 = vld [vmem:[%s2559_s30 + $0x10] sm:$0xf] }
  0x24   : > { %374 = vst [vmem:[%s351_s26] sm:$0xf] %v373_v0  ;;  %v379_v3 = vld [vmem:[%s2559_s30 + $0x18] sm:$0xf]  ;;  %v381_v4 = vld [vmem:[%s2559_s30 + $0x20] sm:$0xf] }
  0x25   : > { %376 = vst [vmem:[%s351_s26 + $0x4] sm:$0xf] %v375_v1  ;;  %v383_v5 = vld [vmem:[%s2559_s30 + $0x28] sm:$0xf]  ;;  %v385_v6 = vld [vmem:[%s2559_s30 + $0x30] sm:$0xf] }
  0x26   : > { %378 = vst [vmem:[%s351_s26 + $0x8] sm:$0xf] %v377_v2  ;;  %v387_v7 = vld [vmem:[%s2559_s30 + $0x38] sm:$0xf]  ;;  %v389_v8 = vld [vmem:[%s2559_s30 + $0x40] sm:$0xf] }
  0x27   : > { %380 = vst [vmem:[%s351_s26 + $0xc] sm:$0xf] %v379_v3  ;;  %v391_v9 = vld [vmem:[%s2559_s30 + $0x48] sm:$0xf]  ;;  %v393_v10 = vld [vmem:[%s2559_s30 + $0x50] sm:$0xf] }
  0x28   : > { %382 = vst [vmem:[%s351_s26 + $0x10] sm:$0xf] %v381_v4  ;;  %v395_v11 = vld [vmem:[%s2559_s30 + $0x58] sm:$0xf]  ;;  %v397_v12 = vld [vmem:[%s2559_s30 + $0x60] sm:$0xf] }
  0x29   : > { %384 = vst [vmem:[%s351_s26 + $0x14] sm:$0xf] %v383_v5  ;;  %v399_v13 = vld [vmem:[%s2559_s30 + $0x68] sm:$0xf]  ;;  %v401_v14 = vld [vmem:[%s2559_s30 + $0x70] sm:$0xf] }
  0x2a   : > { %386 = vst [vmem:[%s351_s26 + $0x18] sm:$0xf] %v385_v6  ;;  %v403_v15 = vld [vmem:[%s2559_s30 + $0x78] sm:$0xf] }
  0x2b   : > { %388 = vst [vmem:[%s351_s26 + $0x1c] sm:$0xf] %v387_v7 }
  0x2c   : > { %390 = vst [vmem:[%s351_s26 + $0x20] sm:$0xf] %v389_v8 }
  0x2d   : > { %392 = vst [vmem:[%s351_s26 + $0x24] sm:$0xf] %v391_v9 }
  0x2e   : > { %394 = vst [vmem:[%s351_s26 + $0x28] sm:$0xf] %v393_v10 }
  0x2f   : > { %396 = vst [vmem:[%s351_s26 + $0x2c] sm:$0xf] %v395_v11 }
  0x30   : > { %398 = vst [vmem:[%s351_s26 + $0x30] sm:$0xf] %v397_v12 }
  0x31   : > { %400 = vst [vmem:[%s351_s26 + $0x34] sm:$0xf] %v399_v13 }
  0x32   : > { %402 = vst [vmem:[%s351_s26 + $0x38] sm:$0xf] %v401_v14 }
  0x33   : > { %404 = vst [vmem:[%s351_s26 + $0x3c] sm:$0xf] %v403_v15 }
  0x34 PF: > { %p2060_p8 = scmp.ge.s32.totalorder %s2417_s25, 1  ;;  %p459_p9 = scmp.lt.s32.totalorder %s2417_s25, 9 }
  0x36   : > { %p460_p10 = pnand %p2060_p8, %p459_p9 }
  0x37   : > { %s466_s10 = sand.u32 (!%p460_p10), 1, %s2385_s17   ;;  %p501_p11 = scmp.eq.s32.totalorder (!%p460_p10), %s2397_s20, 0 }
  0x38   : > { %463 = sbr.rel (%p460_p10) target bundleno = 1320 (0x528), region = 101  ;;  %s2061_s11 = sshll.u32 (!%p460_p10), %s466_s10, 6 }
  0x39   : > { %p502_p12 = scmp.eq.s32.totalorder (!%p460_p10), %s2393_s19, 0  ;;  %p505_p0 = scmp.eq.s32.totalorder (!%p460_p10), %s2401_s21, 0 }
  0x3a   : > { %s2594_s27 = scalar_lea.vmem (!%p460_p10), [#allocation5], %s2061_s11 }
  0x3b   : > { %p2582_p13 = pnand (!%p460_p10), %p502_p12, %p501_p11 }
  0x3d   : > { %p504_p1 = pneg %p2582_p13 }
  0x3f   : > { %p506_p2 = pnand %p505_p0, %p504_p1 }
  0x41   : > { %509 = sbr.rel (%p506_p2) target bundleno = 276 (0x114), region = 109 }
  0x46   : > { %v514_v16 = vld [vmem:[%s3235_s4 + $0x20] sm:$0xff]  ;;  %v512_v18 = vld [vmem:[%s3235_s4 + $0x10] sm:$0xff]  ;;  %v2419_v19 = vmov 0   ;;  %v515_v26 = vld [vmem:[%s3235_s4 + $0x28] sm:$0xff]  ;;  %vm834_vm0 = vcmask 257024  }
  0x47   : > { %v546_v17 = vld [vmem:[%s3233_s2 + $0x20] sm:$0xff]  ;;  %2306 = vset.pattern.permute.xlu2 %v2419_v19  ;;  %2305 = vset.pattern.permute.xlu1 %v2419_v19  ;;  %v544_v21 = vld [vmem:[%s3233_s2 + $0x10] sm:$0xff]  ;;  %v547_v27 = vld [vmem:[%s3233_s2 + $0x28] sm:$0xff] }
  0x48   : > { %v578_v20 = vmul.f32 %v546_v17, %v514_v16  ;;  %v510_v22 = vld [vmem:[%s3235_s4] sm:$0xff]  ;;  %2304 = vset.pattern.permute.xlu0 %v2419_v19  ;;  %v576_v24 = vmul.f32 %v544_v21, %v512_v18  ;;  %v513_v28 = vld [vmem:[%s3235_s4 + $0x18] sm:$0xff]  ;;  %v511_v30 = vld [vmem:[%s3235_s4 + $0x8] sm:$0xff]  ;;  %v579_v32 = vmul.f32 %v547_v27, %v515_v26 }
  0x49   : > { %v542_v23 = vld [vmem:[%s3233_s2] sm:$0xff]  ;;  %v545_v29 = vld [vmem:[%s3233_s2 + $0x18] sm:$0xff]  ;;  %v543_v31 = vld [vmem:[%s3233_s2 + $0x8] sm:$0xff] }
  0x4a   : > { %v574_v25 = vmul.f32 %v542_v23, %v510_v22  ;;  %629 = vperm.xlu2 %2306, %v578_v20   ;;  %619 = vperm.xlu1 %2305, %v576_v24   ;;  %v577_v33 = vmul.f32 %v545_v29, %v513_v28  ;;  %v575_v34 = vmul.f32 %v543_v31, %v511_v30  ;;  %v518_v35 = vld [vmem:[%s3235_s4 + $0x40] sm:$0xff]  ;;  %v517_v37 = vld [vmem:[%s3235_s4 + $0x38] sm:$0xff]  ;;  %v516_v39 = vld [vmem:[%s3235_s4 + $0x30] sm:$0xff] }
  0x4b   : > { %v550_v36 = vld [vmem:[%s3233_s2 + $0x40] sm:$0xff]  ;;  %v549_v38 = vld [vmem:[%s3233_s2 + $0x38] sm:$0xff]  ;;  %v548_v40 = vld [vmem:[%s3233_s2 + $0x30] sm:$0xff] }
  0x4c   : > { %609 = vperm.xlu0 %2304, %v574_v25   ;;  %v582_v41 = vmul.f32 %v550_v36, %v518_v35  ;;  %v581_v42 = vmul.f32 %v549_v38, %v517_v37  ;;  %v580_v43 = vmul.f32 %v548_v40, %v516_v39  ;;  %v521_v44 = vld [vmem:[%s3235_s4 + $0x58] sm:$0xff]  ;;  %v520_v46 = vld [vmem:[%s3235_s4 + $0x50] sm:$0xff]  ;;  %v519_v48 = vld [vmem:[%s3235_s4 + $0x48] sm:$0xff] }
  0x4d   : > { %v553_v45 = vld [vmem:[%s3233_s2 + $0x58] sm:$0xff]  ;;  %v552_v47 = vld [vmem:[%s3233_s2 + $0x50] sm:$0xff]  ;;  %v551_v49 = vld [vmem:[%s3233_s2 + $0x48] sm:$0xff] }
  0x4e   : > { %v585_v50 = vmul.f32 %v553_v45, %v521_v44  ;;  %v584_v51 = vmul.f32 %v552_v47, %v520_v46  ;;  %v583_v52 = vmul.f32 %v551_v49, %v519_v48  ;;  %v524_v53 = vld [vmem:[%s3235_s4 + $0x70] sm:$0xff]  ;;  %v523_v55 = vld [vmem:[%s3235_s4 + $0x68] sm:$0xff]  ;;  %v522_v57 = vld [vmem:[%s3235_s4 + $0x60] sm:$0xff] }
  0x4f   : > { %v556_v54 = vld [vmem:[%s3233_s2 + $0x70] sm:$0xff]  ;;  %v555_v56 = vld [vmem:[%s3233_s2 + $0x68] sm:$0xff]  ;;  %v554_v58 = vld [vmem:[%s3233_s2 + $0x60] sm:$0xff] }
  0x50   : > { %v588_v59 = vmul.f32 %v556_v54, %v524_v53  ;;  %v587_v60 = vmul.f32 %v555_v56, %v523_v55  ;;  %v586_v61 = vmul.f32 %v554_v58, %v522_v57  ;;  %v527_v62 = vld [vmem:[%s3235_s4 + $0x88] sm:$0xff]  ;;  %v526_v0 = vld [vmem:[%s3235_s4 + $0x80] sm:$0xff]  ;;  %v525_v2 = vld [vmem:[%s3235_s4 + $0x78] sm:$0xff] }
  0x51   : > { %v559_v63 = vld [vmem:[%s3233_s2 + $0x88] sm:$0xff]  ;;  %v558_v1 = vld [vmem:[%s3233_s2 + $0x80] sm:$0xff]  ;;  %v557_v3 = vld [vmem:[%s3233_s2 + $0x78] sm:$0xff] }
  0x52   : > { %634 = vperm.xlu2 %2306, %v579_v32   ;;  %624 = vperm.xlu1 %2305, %v577_v33   ;;  %v591_v4 = vmul.f32 %v559_v63, %v527_v62  ;;  %v590_v5 = vmul.f32 %v558_v1, %v526_v0  ;;  %v589_v6 = vmul.f32 %v557_v3, %v525_v2  ;;  %v530_v7 = vld [vmem:[%s3235_s4 + $0xa0] sm:$0xff]  ;;  %v529_v9 = vld [vmem:[%s3235_s4 + $0x98] sm:$0xff]  ;;  %v528_v11 = vld [vmem:[%s3235_s4 + $0x90] sm:$0xff] }
  0x53   : > { %v562_v8 = vld [vmem:[%s3233_s2 + $0xa0] sm:$0xff]  ;;  %v561_v10 = vld [vmem:[%s3233_s2 + $0x98] sm:$0xff]  ;;  %v560_v12 = vld [vmem:[%s3233_s2 + $0x90] sm:$0xff] }
  0x54   : > { %614 = vperm.xlu0 %2304, %v575_v34   ;;  %v594_v13 = vmul.f32 %v562_v8, %v530_v7  ;;  %v593_v14 = vmul.f32 %v561_v10, %v529_v9  ;;  %v592_v15 = vmul.f32 %v560_v12, %v528_v11  ;;  %v533_v16 = vld [vmem:[%s3235_s4 + $0xb8] sm:$0xff]  ;;  %v532_v18 = vld [vmem:[%s3235_s4 + $0xb0] sm:$0xff]  ;;  %v531_v20 = vld [vmem:[%s3235_s4 + $0xa8] sm:$0xff] }
  0x55   : > { %v565_v17 = vld [vmem:[%s3233_s2 + $0xb8] sm:$0xff]  ;;  %v564_v19 = vld [vmem:[%s3233_s2 + $0xb0] sm:$0xff]  ;;  %v563_v21 = vld [vmem:[%s3233_s2 + $0xa8] sm:$0xff] }
  0x56   : > { %v597_v22 = vmul.f32 %v565_v17, %v533_v16  ;;  %v596_v23 = vmul.f32 %v564_v19, %v532_v18  ;;  %v595_v24 = vmul.f32 %v563_v21, %v531_v20  ;;  %v536_v25 = vld [vmem:[%s3235_s4 + $0xd0] sm:$0xff]  ;;  %v535_v27 = vld [vmem:[%s3235_s4 + $0xc8] sm:$0xff]  ;;  %v534_v29 = vld [vmem:[%s3235_s4 + $0xc0] sm:$0xff] }
  0x57   : > { %v568_v26 = vld [vmem:[%s3233_s2 + $0xd0] sm:$0xff]  ;;  %v567_v28 = vld [vmem:[%s3233_s2 + $0xc8] sm:$0xff]  ;;  %v566_v30 = vld [vmem:[%s3233_s2 + $0xc0] sm:$0xff] }
  0x58   : > { %v600_v31 = vmul.f32 %v568_v26, %v536_v25  ;;  %v599_v32 = vmul.f32 %v567_v28, %v535_v27  ;;  %v598_v33 = vmul.f32 %v566_v30, %v534_v29  ;;  %v539_v34 = vld [vmem:[%s3235_s4 + $0xe8] sm:$0xff]  ;;  %v538_v36 = vld [vmem:[%s3235_s4 + $0xe0] sm:$0xff]  ;;  %v537_v38 = vld [vmem:[%s3235_s4 + $0xd8] sm:$0xff] }
  0x59   : > { %v571_v35 = vld [vmem:[%s3233_s2 + $0xe8] sm:$0xff]  ;;  %v570_v37 = vld [vmem:[%s3233_s2 + $0xe0] sm:$0xff]  ;;  %v569_v39 = vld [vmem:[%s3233_s2 + $0xd8] sm:$0xff] }
  0x5a   : > { %649 = vperm.xlu2 %2306, %v582_v41   ;;  %644 = vperm.xlu1 %2305, %v581_v42   ;;  %v603_v40 = vmul.f32 %v571_v35, %v539_v34  ;;  %v602_v41 = vmul.f32 %v570_v37, %v538_v36  ;;  %v601_v42 = vmul.f32 %v569_v39, %v537_v38  ;;  %v573_v44 = vld [vmem:[%s3233_s2 + $0xf8] sm:$0xff]  ;;  %v540_v45 = vld [vmem:[%s3235_s4 + $0xf0] sm:$0xff]  ;;  %v2791_v49 = vld [vmem:[%s3236_s5] ss:$0 sm:$0xff] }
  0x5b   : > { %v572_v46 = vld [vmem:[%s3233_s2 + $0xf0] sm:$0xff] }
  0x5c   : > { %639 = vperm.xlu0 %2304, %v580_v43   ;;  %v541_v43 = vld [vmem:[%s3235_s4 + $0xf8] sm:$0xff]  ;;  %v604_v48 = vmul.f32 %v572_v46, %v540_v45 }
  0x5d   : > { %v605_v47 = vmul.f32 %v573_v44, %v541_v43 }
  0x62   : > { %664 = vperm.xlu2 %2306, %v585_v50   ;;  %659 = vperm.xlu1 %2305, %v584_v51  }
  0x64   : > { %654 = vperm.xlu0 %2304, %v583_v52  }
  0x6a   : > { %679 = vperm.xlu2 %2306, %v588_v59   ;;  %674 = vperm.xlu1 %2305, %v587_v60  }
  0x6c   : > { %669 = vperm.xlu0 %2304, %v586_v61  }
  0x72   : > { %694 = vperm.xlu2 %2306, %v591_v4   ;;  %689 = vperm.xlu1 %2305, %v590_v5  }
  0x74   : > { %684 = vperm.xlu0 %2304, %v589_v6  }
  0x7a   : > { %709 = vperm.xlu2 %2306, %v594_v13   ;;  %704 = vperm.xlu1 %2305, %v593_v14  }
  0x7c   : > { %699 = vperm.xlu0 %2304, %v592_v15  }
  0x82   : > { %724 = vperm.xlu2 %2306, %v597_v22   ;;  %719 = vperm.xlu1 %2305, %v596_v23  }
  0x84   : > { %714 = vperm.xlu0 %2304, %v595_v24  }
  0x8a   : > { %739 = vperm.xlu2 %2306, %v600_v31   ;;  %734 = vperm.xlu1 %2305, %v599_v32  }
  0x8c   : > { %729 = vperm.xlu0 %2304, %v598_v33  }
  0x92   : > { %754 = vperm.xlu2 %2306, %v603_v40   ;;  %749 = vperm.xlu1 %2305, %v602_v41  }
  0x94   : > { %744 = vperm.xlu0 %2304, %v601_v42  }
  0x9a   : > { %764 = vperm.xlu1 %2305, %v605_v47  }
  0x9c   : > { %759 = vperm.xlu0 %2304, %v604_v48  }
  0xa4   : > { %v630_v50 = vpop.permute.xlu2 %629 }
  0xa5   : > { %v774_v51 = vmul.f32 %v2791_v49, %v630_v50 }
  0xa7   : > { %v806_v52 = vpack.c.bf16 %v774_v51, %v774_v51 }
  0xa9   : > { %839 = vst.msk [vmem:[#allocation3 + $0x10] sm:$0xf] %vm834_vm0, %v806_v52 }
  0xac   : > { %v635_v53 = vpop.permute.xlu2 %634 }
  0xad   : > { %v775_v54 = vmul.f32 %v2791_v49, %v635_v53 }
  0xaf   : > { %v807_v55 = vpack.c.bf16 %v775_v54, %v775_v54 }
  0xb1   : > { %840 = vst.msk [vmem:[#allocation3 + $0x14] sm:$0xf] %vm834_vm0, %v807_v55 }
  0xb4   : > { %v650_v56 = vpop.permute.xlu2 %649 }
  0xb5   : > { %v778_v57 = vmul.f32 %v2791_v49, %v650_v56 }
  0xb7   : > { %v810_v58 = vpack.c.bf16 %v778_v57, %v778_v57 }
  0xb9   : > { %843 = vst.msk [vmem:[#allocation3 + $0x20] sm:$0xf] %vm834_vm0, %v810_v58 }
  0xbc   : > { %v665_v59 = vpop.permute.xlu2 %664  ;;  %v620_v61 = vpop.permute.xlu1 %619 }
  0xbd   : > { %v781_v60 = vmul.f32 %v2791_v49, %v665_v59  ;;  %v772_v63 = vmul.f32 %v2791_v49, %v620_v61 }
  0xbe   : > { %v610_v62 = vpop.permute.xlu0 %609 }
  0xbf   : > { %v770_v0 = vmul.f32 %v2791_v49, %v610_v62  ;;  %v813_v1 = vpack.c.bf16 %v781_v60, %v781_v60  ;;  %v804_v2 = vpack.c.bf16 %v772_v63, %v772_v63 }
  0xc1   : > { %v802_v3 = vpack.c.bf16 %v770_v0, %v770_v0  ;;  %846 = vst.msk [vmem:[#allocation3 + $0x2c] sm:$0xf] %vm834_vm0, %v813_v1 }
  0xc2   : > { %837 = vst.msk [vmem:[#allocation3 + $0x8] sm:$0xf] %vm834_vm0, %v804_v2 }
  0xc3   : > { %835 = vst.msk [vmem:[#allocation3] sm:$0xf] %vm834_vm0, %v802_v3 }
  0xc4   : > { %v680_v4 = vpop.permute.xlu2 %679  ;;  %v625_v6 = vpop.permute.xlu1 %624 }
  0xc5   : > { %v784_v5 = vmul.f32 %v2791_v49, %v680_v4  ;;  %v773_v8 = vmul.f32 %v2791_v49, %v625_v6 }
  0xc6   : > { %v615_v7 = vpop.permute.xlu0 %614 }
  0xc7   : > { %v771_v9 = vmul.f32 %v2791_v49, %v615_v7  ;;  %v816_v10 = vpack.c.bf16 %v784_v5, %v784_v5  ;;  %v805_v11 = vpack.c.bf16 %v773_v8, %v773_v8 }
  0xc9   : > { %v803_v12 = vpack.c.bf16 %v771_v9, %v771_v9  ;;  %849 = vst.msk [vmem:[#allocation3 + $0x38] sm:$0xf] %vm834_vm0, %v816_v10 }
  0xca   : > { %838 = vst.msk [vmem:[#allocation3 + $0xc] sm:$0xf] %vm834_vm0, %v805_v11 }
  0xcb   : > { %836 = vst.msk [vmem:[#allocation3 + $0x4] sm:$0xf] %vm834_vm0, %v803_v12 }
  0xcc   : > { %v695_v13 = vpop.permute.xlu2 %694  ;;  %v645_v15 = vpop.permute.xlu1 %644 }
  0xcd   : > { %v787_v14 = vmul.f32 %v2791_v49, %v695_v13  ;;  %v777_v17 = vmul.f32 %v2791_v49, %v645_v15 }
  0xce   : > { %v640_v16 = vpop.permute.xlu0 %639 }
  0xcf   : > { %v776_v18 = vmul.f32 %v2791_v49, %v640_v16  ;;  %v819_v19 = vpack.c.bf16 %v787_v14, %v787_v14  ;;  %v809_v20 = vpack.c.bf16 %v777_v17, %v777_v17 }
  0xd1   : > { %v808_v21 = vpack.c.bf16 %v776_v18, %v776_v18  ;;  %852 = vst.msk [vmem:[#allocation3 + $0x44] sm:$0xf] %vm834_vm0, %v819_v19 }
  0xd2   : > { %842 = vst.msk [vmem:[#allocation3 + $0x1c] sm:$0xf] %vm834_vm0, %v809_v20 }
  0xd3   : > { %841 = vst.msk [vmem:[#allocation3 + $0x18] sm:$0xf] %vm834_vm0, %v808_v21 }
  0xd4   : > { %v710_v22 = vpop.permute.xlu2 %709  ;;  %v660_v24 = vpop.permute.xlu1 %659 }
  0xd5   : > { %v790_v23 = vmul.f32 %v2791_v49, %v710_v22  ;;  %v780_v26 = vmul.f32 %v2791_v49, %v660_v24 }
  0xd6   : > { %v655_v25 = vpop.permute.xlu0 %654 }
  0xd7   : > { %v779_v27 = vmul.f32 %v2791_v49, %v655_v25  ;;  %v822_v28 = vpack.c.bf16 %v790_v23, %v790_v23  ;;  %v812_v29 = vpack.c.bf16 %v780_v26, %v780_v26 }
  0xd9   : > { %v811_v30 = vpack.c.bf16 %v779_v27, %v779_v27  ;;  %855 = vst.msk [vmem:[#allocation3 + $0x50] sm:$0xf] %vm834_vm0, %v822_v28 }
  0xda   : > { %845 = vst.msk [vmem:[#allocation3 + $0x28] sm:$0xf] %vm834_vm0, %v812_v29 }
  0xdb   : > { %844 = vst.msk [vmem:[#allocation3 + $0x24] sm:$0xf] %vm834_vm0, %v811_v30 }
  0xdc   : > { %v725_v31 = vpop.permute.xlu2 %724  ;;  %v675_v33 = vpop.permute.xlu1 %674 }
  0xdd   : > { %v793_v32 = vmul.f32 %v2791_v49, %v725_v31  ;;  %v783_v35 = vmul.f32 %v2791_v49, %v675_v33 }
  0xde   : > { %v670_v34 = vpop.permute.xlu0 %669 }
  0xdf   : > { %v782_v36 = vmul.f32 %v2791_v49, %v670_v34  ;;  %v825_v37 = vpack.c.bf16 %v793_v32, %v793_v32  ;;  %v815_v38 = vpack.c.bf16 %v783_v35, %v783_v35 }
  0xe1   : > { %v814_v39 = vpack.c.bf16 %v782_v36, %v782_v36  ;;  %858 = vst.msk [vmem:[#allocation3 + $0x5c] sm:$0xf] %vm834_vm0, %v825_v37 }
  0xe2   : > { %848 = vst.msk [vmem:[#allocation3 + $0x34] sm:$0xf] %vm834_vm0, %v815_v38 }
  0xe3   : > { %847 = vst.msk [vmem:[#allocation3 + $0x30] sm:$0xf] %vm834_vm0, %v814_v39 }
  0xe4   : > { %v740_v40 = vpop.permute.xlu2 %739  ;;  %v690_v42 = vpop.permute.xlu1 %689 }
  0xe5   : > { %v796_v41 = vmul.f32 %v2791_v49, %v740_v40  ;;  %v786_v44 = vmul.f32 %v2791_v49, %v690_v42 }
  0xe6   : > { %v685_v43 = vpop.permute.xlu0 %684 }
  0xe7   : > { %v785_v45 = vmul.f32 %v2791_v49, %v685_v43  ;;  %v828_v46 = vpack.c.bf16 %v796_v41, %v796_v41  ;;  %v818_v47 = vpack.c.bf16 %v786_v44, %v786_v44 }
  0xe9   : > { %v817_v48 = vpack.c.bf16 %v785_v45, %v785_v45  ;;  %861 = vst.msk [vmem:[#allocation3 + $0x68] sm:$0xf] %vm834_vm0, %v828_v46 }
  0xea   : > { %851 = vst.msk [vmem:[#allocation3 + $0x40] sm:$0xf] %vm834_vm0, %v818_v47 }
  0xeb   : > { %850 = vst.msk [vmem:[#allocation3 + $0x3c] sm:$0xf] %vm834_vm0, %v817_v48 }
  0xec   : > { %v755_v50 = vpop.permute.xlu2 %754  ;;  %v705_v52 = vpop.permute.xlu1 %704 }
  0xed   : > { %v799_v51 = vmul.f32 %v2791_v49, %v755_v50  ;;  %v789_v54 = vmul.f32 %v2791_v49, %v705_v52 }
  0xee   : > { %v700_v53 = vpop.permute.xlu0 %699 }
  0xef   : > { %v788_v55 = vmul.f32 %v2791_v49, %v700_v53  ;;  %v831_v56 = vpack.c.bf16 %v799_v51, %v799_v51  ;;  %v821_v57 = vpack.c.bf16 %v789_v54, %v789_v54 }
  0xf1   : > { %v820_v58 = vpack.c.bf16 %v788_v55, %v788_v55  ;;  %864 = vst.msk [vmem:[#allocation3 + $0x74] sm:$0xf] %vm834_vm0, %v831_v56 }
  0xf2   : > { %854 = vst.msk [vmem:[#allocation3 + $0x4c] sm:$0xf] %vm834_vm0, %v821_v57 }
  0xf3   : > { %853 = vst.msk [vmem:[#allocation3 + $0x48] sm:$0xf] %vm834_vm0, %v820_v58 }
  0xf4   : > { %v720_v59 = vpop.permute.xlu1 %719 }
  0xf5   : > { %v792_v61 = vmul.f32 %v2791_v49, %v720_v59 }
  0xf6   : > { %v715_v60 = vpop.permute.xlu0 %714 }
  0xf7   : > { %v791_v62 = vmul.f32 %v2791_v49, %v715_v60  ;;  %v824_v63 = vpack.c.bf16 %v792_v61, %v792_v61 }
  0xf9   : > { %v823_v0 = vpack.c.bf16 %v791_v62, %v791_v62  ;;  %857 = vst.msk [vmem:[#allocation3 + $0x58] sm:$0xf] %vm834_vm0, %v824_v63 }
  0xfb   : > { %856 = vst.msk [vmem:[#allocation3 + $0x54] sm:$0xf] %vm834_vm0, %v823_v0 }
  0xfc   : > { %v735_v1 = vpop.permute.xlu1 %734 }
  0xfd   : > { %v795_v3 = vmul.f32 %v2791_v49, %v735_v1 }
  0xfe   : > { %v730_v2 = vpop.permute.xlu0 %729 }
  0xff   : > { %v794_v4 = vmul.f32 %v2791_v49, %v730_v2  ;;  %v827_v5 = vpack.c.bf16 %v795_v3, %v795_v3 }
 0x101   : > { %v826_v6 = vpack.c.bf16 %v794_v4, %v794_v4  ;;  %860 = vst.msk [vmem:[#allocation3 + $0x64] sm:$0xf] %vm834_vm0, %v827_v5 }
 0x103   : > { %859 = vst.msk [vmem:[#allocation3 + $0x60] sm:$0xf] %vm834_vm0, %v826_v6 }
 0x104   : > { %v750_v7 = vpop.permute.xlu1 %749 }
 0x105   : > { %v798_v9 = vmul.f32 %v2791_v49, %v750_v7 }
 0x106   : > { %v745_v8 = vpop.permute.xlu0 %744 }
 0x107   : > { %v797_v10 = vmul.f32 %v2791_v49, %v745_v8  ;;  %v830_v11 = vpack.c.bf16 %v798_v9, %v798_v9 }
 0x109   : > { %v829_v12 = vpack.c.bf16 %v797_v10, %v797_v10  ;;  %863 = vst.msk [vmem:[#allocation3 + $0x70] sm:$0xf] %vm834_vm0, %v830_v11 }
 0x10b   : > { %862 = vst.msk [vmem:[#allocation3 + $0x6c] sm:$0xf] %vm834_vm0, %v829_v12 }
 0x10c   : > { %v765_v13 = vpop.permute.xlu1 %764 }
 0x10d   : > { %v801_v15 = vmul.f32 %v2791_v49, %v765_v13 }
 0x10e   : > { %v760_v14 = vpop.permute.xlu0 %759 }
 0x10f   : > { %v800_v16 = vmul.f32 %v2791_v49, %v760_v14  ;;  %v833_v17 = vpack.c.bf16 %v801_v15, %v801_v15 }
 0x111   : > { %v832_v18 = vpack.c.bf16 %v800_v16, %v800_v16  ;;  %866 = vst.msk [vmem:[#allocation3 + $0x7c] sm:$0xf] %vm834_vm0, %v833_v17 }
 0x113   : > { %865 = vst.msk [vmem:[#allocation3 + $0x78] sm:$0xf] %vm834_vm0, %v832_v18 }
 0x114 PF: > { %p867_p3 = scmp.eq.s32.totalorder %s2401_s21, 1 }
 0x116   : > { %p868_p4 = pnand %p867_p3, %p504_p1 }
 0x118   : > { %871 = sbr.rel (%p868_p4) target bundleno = 615 (0x267), region = 113 }
 0x11d   : > { %v889_v49 = vld [vmem:[%s3235_s4 + $0x88] sm:$0xff]  ;;  %v888_v19 = vld [vmem:[%s3235_s4 + $0x80] sm:$0xff]  ;;  %v2420_v21 = vmov 0   ;;  %v890_v25 = vld [vmem:[%s3235_s4 + $0x90] sm:$0xff]  ;;  %vm1132_vm1 = vcmask 261120   ;;  %vm1374_vm2 = vcmask 257024  }
 0x11e   : > { %v872_v20 = vld [vmem:[%s3235_s4] sm:$0xff]  ;;  %2310 = vset.pattern.permute.xlu2 %v2420_v21  ;;  %2309 = vset.pattern.permute.xlu1 %v2420_v21  ;;  %v897_v22 = vld [vmem:[%s3235_s4 + $0xc8] sm:$0xff]  ;;  %v882_v28 = vld [vmem:[%s3235_s4 + $0x50] sm:$0xff] }
 0x11f   : > { %2308 = vset.pattern.permute.xlu0 %v2420_v21  ;;  %1023 = vperm.xlu2 %2310, %v889_v49   ;;  %v896_v23 = vld [vmem:[%s3235_s4 + $0xc0] sm:$0xff]  ;;  %v873_v26 = vld [vmem:[%s3235_s4 + $0x8] sm:$0xff]  ;;  %v898_v29 = vld [vmem:[%s3235_s4 + $0xd0] sm:$0xff] }
 0x120   : > { %1018 = vperm.xlu0 %2308, %v888_v19   ;;  %938 = vperm.xlu1 %2309, %v872_v20   ;;  %v880_v24 = vld [vmem:[%s3235_s4 + $0x40] sm:$0xff]  ;;  %v881_v27 = vld [vmem:[%s3235_s4 + $0x48] sm:$0xff]  ;;  %v874_v30 = vld [vmem:[%s3235_s4 + $0x10] sm:$0xff] }
 0x121   : > { %v875_v31 = vld [vmem:[%s3235_s4 + $0x18] sm:$0xff]  ;;  %v900_v34 = vld [vmem:[%s3235_s4 + $0xe0] sm:$0xff]  ;;  %v893_v37 = vld [vmem:[%s3235_s4 + $0xa8] sm:$0xff] }
 0x122   : > { %v891_v32 = vld [vmem:[%s3235_s4 + $0x98] sm:$0xff]  ;;  %v892_v36 = vld [vmem:[%s3235_s4 + $0xa0] sm:$0xff]  ;;  %v885_v40 = vld [vmem:[%s3235_s4 + $0x68] sm:$0xff] }
 0x123   : > { %v899_v33 = vld [vmem:[%s3235_s4 + $0xd8] sm:$0xff]  ;;  %v876_v38 = vld [vmem:[%s3235_s4 + $0x20] sm:$0xff]  ;;  %v901_v41 = vld [vmem:[%s3235_s4 + $0xe8] sm:$0xff] }
 0x124   : > { %v883_v35 = vld [vmem:[%s3235_s4 + $0x58] sm:$0xff]  ;;  %v884_v39 = vld [vmem:[%s3235_s4 + $0x60] sm:$0xff]  ;;  %v877_v42 = vld [vmem:[%s3235_s4 + $0x28] sm:$0xff] }
 0x125   : > { %v878_v43 = vld [vmem:[%s3235_s4 + $0x30] sm:$0xff]  ;;  %v903_v46 = vld [vmem:[%s3235_s4 + $0xf8] sm:$0xff]  ;;  %v1129_v52 = vld [vmem:[%s3238_s7 + $0x8] sm:$0xff] }
 0x126   : > { %v894_v44 = vld [vmem:[%s3235_s4 + $0xb0] sm:$0xff]  ;;  %v895_v48 = vld [vmem:[%s3235_s4 + $0xb8] sm:$0xff]  ;;  %v1128_v55 = vld [vmem:[%s3238_s7] sm:$0xff] }
 0x127   : > { %1063 = vperm.xlu2 %2310, %v897_v22   ;;  %v902_v45 = vld [vmem:[%s3235_s4 + $0xf0] sm:$0xff]  ;;  %v1131_v50 = vld [vmem:[%s3238_s7 + $0x18] sm:$0xff]  ;;  %v920_v58 = vld [vmem:[#allocation4 + $0x80] sm:$0xff] }
 0x128   : > { %1058 = vperm.xlu0 %2308, %v896_v23   ;;  %978 = vperm.xlu1 %2309, %v880_v24   ;;  %v886_v47 = vld [vmem:[%s3235_s4 + $0x70] sm:$0xff]  ;;  %v879_v53 = vld [vmem:[%s3235_s4 + $0x38] sm:$0xff]  ;;  %v904_v59 = vld [vmem:[#allocation4] sm:$0xff] }
 0x129   : > { %v1130_v51 = vld [vmem:[%s3238_s7 + $0x10] sm:$0xff]  ;;  %1241 = vmatpush.msra.mxu0 %v1131_v50  ;;  %2186 = vmatpush.msra.mxu2 %v1131_v50  ;;  %v887_v54 = vld [vmem:[%s3235_s4 + $0x78] sm:$0xff]  ;;  %v928_v2 = vld [vmem:[#allocation4 + $0xc0] sm:$0xff] }
 0x12a   : > { %2185 = vmatpush.msra.mxu1 %v1131_v50  ;;  %2187 = vmatpush.msra.mxu3 %v1131_v50  ;;  %v921_v1 = vld [vmem:[#allocation4 + $0x88] sm:$0xff]  ;;  %v912_v3 = vld [vmem:[#allocation4 + $0x40] sm:$0xff]  ;;  %v922_v13 = vld [vmem:[#allocation4 + $0x90] sm:$0xff] }
 0x12b   : > { %1242 = vmatpush.msra.mxu0 %v1130_v51  ;;  %2189 = vmatpush.msra.mxu2 %v1130_v51  ;;  %v905_v10 = vld [vmem:[#allocation4 + $0x8] sm:$0xff]  ;;  %v914_v20 = vld [vmem:[#allocation4 + $0x50] sm:$0xff] }
 0x12c   : > { %2188 = vmatpush.msra.mxu1 %v1130_v51  ;;  %2190 = vmatpush.msra.mxu3 %v1130_v51  ;;  %v913_v11 = vld [vmem:[#allocation4 + $0x48] sm:$0xff]  ;;  %v930_v21 = vld [vmem:[#allocation4 + $0xd0] sm:$0xff] }
 0x12d   : > { %1243 = vmatpush.msra.mxu0 %v1129_v52  ;;  %2192 = vmatpush.msra.mxu2 %v1129_v52  ;;  %v929_v12 = vld [vmem:[#allocation4 + $0xc8] sm:$0xff]  ;;  %v906_v22 = vld [vmem:[#allocation4 + $0x10] sm:$0xff] }
 0x12e   : > { %2191 = vmatpush.msra.mxu1 %v1129_v52  ;;  %2193 = vmatpush.msra.mxu3 %v1129_v52 }
 0x12f   : > { %1028 = vperm.xlu2 %2310, %v890_v25   ;;  %1244 = vmatpush.msra.mxu0 %v1128_v55 }
 0x130   : > { %943 = vperm.xlu0 %2308, %v873_v26   ;;  %983 = vperm.xlu1 %2309, %v881_v27  }
 0x131   : > { %2195 = vmatpush.msra.mxu2 %v1128_v55  ;;  %2194 = vmatpush.msra.mxu1 %v1128_v55 }
 0x132   : > { %2196 = vmatpush.msra.mxu3 %v1128_v55 }
 0x137   : > { %988 = vperm.xlu2 %2310, %v882_v28   ;;  %v907_v28 = vld [vmem:[#allocation4 + $0x18] sm:$0xff] }
 0x138   : > { %1068 = vperm.xlu0 %2308, %v898_v29   ;;  %948 = vperm.xlu1 %2309, %v874_v30   ;;  %v923_v29 = vld [vmem:[#allocation4 + $0x98] sm:$0xff] }
 0x139   : > { %v931_v30 = vld [vmem:[#allocation4 + $0xd8] sm:$0xff] }
 0x13f   : > { %953 = vperm.xlu2 %2310, %v875_v31  }
 0x140   : > { %1033 = vperm.xlu0 %2308, %v891_v32   ;;  %1073 = vperm.xlu1 %2309, %v899_v33  }
 0x147   : > { %1078 = vperm.xlu2 %2310, %v900_v34  }
 0x148   : > { %993 = vperm.xlu0 %2308, %v883_v35   ;;  %1038 = vperm.xlu1 %2309, %v892_v36  }
 0x14f   : > { %1043 = vperm.xlu2 %2310, %v893_v37   ;;  %v915_v37 = vld [vmem:[#allocation4 + $0x58] sm:$0xff] }
 0x150   : > { %958 = vperm.xlu0 %2308, %v876_v38   ;;  %998 = vperm.xlu1 %2309, %v884_v39   ;;  %v924_v38 = vld [vmem:[#allocation4 + $0xa0] sm:$0xff] }
 0x151   : > { %v932_v39 = vld [vmem:[#allocation4 + $0xe0] sm:$0xff] }
 0x157   : > { %1003 = vperm.xlu2 %2310, %v885_v40  }
 0x158   : > { %1083 = vperm.xlu0 %2308, %v901_v41   ;;  %963 = vperm.xlu1 %2309, %v877_v42  }
 0x15f   : > { %968 = vperm.xlu2 %2310, %v878_v43  }
 0x160   : > { %1048 = vperm.xlu0 %2308, %v894_v44   ;;  %1088 = vperm.xlu1 %2309, %v902_v45  }
 0x167   : > { %1093 = vperm.xlu2 %2310, %v903_v46   ;;  %v908_v46 = vld [vmem:[#allocation4 + $0x20] sm:$0xff] }
 0x168   : > { %1008 = vperm.xlu0 %2308, %v886_v47   ;;  %1053 = vperm.xlu1 %2309, %v895_v48   ;;  %v916_v47 = vld [vmem:[#allocation4 + $0x60] sm:$0xff]  ;;  %v925_v48 = vld [vmem:[#allocation4 + $0xa8] sm:$0xff] }
 0x170   : > { %973 = vperm.xlu0 %2308, %v879_v53   ;;  %1013 = vperm.xlu1 %2309, %v887_v54  }
 0x179   : > { %v1024_v56 = vpop.permute.xlu2 %1023 }
 0x17a   : > { %v1113_v6 = vmul.f32 %v1024_v56, %v921_v1  ;;  %v917_v56 = vld [vmem:[#allocation4 + $0x68] sm:$0xff]  ;;  %v910_v1 = vld [vmem:[#allocation4 + $0x30] sm:$0xff] }
 0x181   : > { %v1064_v57 = vpop.permute.xlu2 %1063 }
 0x182   : > { %v1121_v18 = vmul.f32 %v1064_v57, %v929_v12  ;;  %v933_v57 = vld [vmem:[#allocation4 + $0xe8] sm:$0xff] }
 0x189   : > { %v1029_v62 = vpop.permute.xlu2 %1028 }
 0x18a   : > { %v1114_v49 = vmul.f32 %v1029_v62, %v922_v13 }
 0x191   : > { %v989_v9 = vpop.permute.xlu2 %988 }
 0x192   : > { %v1019_v60 = vpop.permute.xlu0 %1018  ;;  %v939_v61 = vpop.permute.xlu1 %938  ;;  %v1106_v25 = vmul.f32 %v989_v9, %v914_v20  ;;  %v918_v9 = vld [vmem:[#allocation4 + $0x70] sm:$0xff] }
 0x193   : > { %v1112_v63 = vmul.f32 %v1019_v60, %v920_v58  ;;  %v1096_v0 = vmul.f32 %v939_v61, %v904_v59  ;;  %v909_v58 = vld [vmem:[#allocation4 + $0x28] sm:$0xff] }
 0x195   : > { %2062 = vmatmul.msk.f32.vlgmr.msra.gmra.mxu0 %vm1132_vm1, %v1096_v0  ;;  %2078 = vmatmul.msk.f32.vlgmr.msra.gmra.mxu2 %vm1132_vm1, %v1112_v63 }
 0x199   : > { %v954_v19 = vpop.permute.xlu2 %953 }
 0x19a   : > { %v1059_v4 = vpop.permute.xlu0 %1058  ;;  %v979_v5 = vpop.permute.xlu1 %978  ;;  %v1099_v34 = vmul.f32 %v954_v19, %v907_v28 }
 0x19b   : > { %v1120_v7 = vmul.f32 %v1059_v4, %v928_v2  ;;  %v1104_v8 = vmul.f32 %v979_v5, %v912_v3  ;;  %v926_v2 = vld [vmem:[#allocation4 + $0xb0] sm:$0xff] }
 0x19c   : > { %v934_v3 = vld [vmem:[#allocation4 + $0xf0] sm:$0xff] }
 0x19d   : > { %2070 = vmatmul.msk.f32.vlgmr.msra.gmra.mxu1 %vm1132_vm1, %v1104_v8  ;;  %2079 = vmatmul.msk.f32.gmra.mxu2 %vm1132_vm1, %v1113_v6 }
 0x19e   : > { %2086 = vmatmul.msk.f32.vlgmr.msra.gmra.mxu3 %vm1132_vm1, %v1120_v7 }
 0x1a1   : > { %v1079_v31 = vpop.permute.xlu2 %1078 }
 0x1a2   : > { %v944_v14 = vpop.permute.xlu0 %943  ;;  %v984_v15 = vpop.permute.xlu1 %983  ;;  %v1124_v45 = vmul.f32 %v1079_v31, %v932_v39 }
 0x1a3   : > { %v1097_v16 = vmul.f32 %v944_v14, %v905_v10  ;;  %v1105_v17 = vmul.f32 %v984_v15, %v913_v11  ;;  %v927_v10 = vld [vmem:[#allocation4 + $0xb8] sm:$0xff] }
 0x1a4   : > { %v935_v11 = vld [vmem:[#allocation4 + $0xf8] sm:$0xff] }
 0x1a5   : > { %2063 = vmatmul.msk.f32.gmra.mxu0 %vm1132_vm1, %v1097_v16  ;;  %2071 = vmatmul.msk.f32.gmra.mxu1 %vm1132_vm1, %v1105_v17 }
 0x1a6   : > { %2080 = vmatmul.msk.f32.gmra.mxu2 %vm1132_vm1, %v1114_v49  ;;  %2087 = vmatmul.msk.f32.gmra.mxu3 %vm1132_vm1, %v1121_v18  ;;  %v911_v18 = vld [vmem:[#allocation4 + $0x38] sm:$0xff] }
 0x1a7   : > { %v919_v49 = vld [vmem:[#allocation4 + $0x78] sm:$0xff] }
 0x1a9   : > { %v1044_v42 = vpop.permute.xlu2 %1043 }
 0x1aa   : > { %v1069_v23 = vpop.permute.xlu0 %1068  ;;  %v949_v24 = vpop.permute.xlu1 %948  ;;  %v1117_v54 = vmul.f32 %v1044_v42, %v925_v48 }
 0x1ab   : > { %v1122_v26 = vmul.f32 %v1069_v23, %v930_v21  ;;  %v1098_v27 = vmul.f32 %v949_v24, %v906_v22 }
 0x1ad   : > { %2064 = vmatmul.msk.f32.gmra.mxu0 %vm1132_vm1, %v1098_v27  ;;  %2072 = vmatmul.msk.f32.gmra.mxu1 %vm1132_vm1, %v1106_v25 }
 0x1ae   : > { %2088 = vmatmul.msk.f32.gmra.mxu3 %vm1132_vm1, %v1122_v26 }
 0x1b1   : > { %v1004_v55 = vpop.permute.xlu2 %1003 }
 0x1b2   : > { %v1034_v32 = vpop.permute.xlu0 %1033  ;;  %v1074_v33 = vpop.permute.xlu1 %1073  ;;  %v1109_v61 = vmul.f32 %v1004_v55, %v917_v56 }
 0x1b3   : > { %v1115_v35 = vmul.f32 %v1034_v32, %v923_v29  ;;  %v1123_v36 = vmul.f32 %v1074_v33, %v931_v30 }
 0x1b5   : > { %2065 = vmatmul.msk.f32.gmra.mxu0 %vm1132_vm1, %v1099_v34  ;;  %2081 = vmatmul.msk.f32.gmra.mxu2 %vm1132_vm1, %v1115_v35 }
 0x1b6   : > { %2089 = vmatmul.msk.f32.gmra.mxu3 %vm1132_vm1, %v1123_v36 }
 0x1b9   : > { %v969_v0 = vpop.permute.xlu2 %968 }
 0x1ba   : > { %v994_v40 = vpop.permute.xlu0 %993  ;;  %v1039_v41 = vpop.permute.xlu1 %1038  ;;  %v1102_v6 = vmul.f32 %v969_v0, %v910_v1 }
 0x1bb   : > { %v1107_v43 = vmul.f32 %v994_v40, %v915_v37  ;;  %v1116_v44 = vmul.f32 %v1039_v41, %v924_v38 }
 0x1bd   : > { %2073 = vmatmul.msk.f32.gmra.mxu1 %vm1132_vm1, %v1107_v43  ;;  %2082 = vmatmul.msk.f32.gmra.mxu2 %vm1132_vm1, %v1116_v44 }
 0x1be   : > { %2090 = vmatmul.msk.f32.gmra.mxu3 %vm1132_vm1, %v1124_v45 }
 0x1c1   : > { %v1094_v12 = vpop.permute.xlu2 %1093 }
 0x1c2   : > { %v959_v50 = vpop.permute.xlu0 %958  ;;  %v999_v51 = vpop.permute.xlu1 %998  ;;  %v1127_v17 = vmul.f32 %v1094_v12, %v935_v11 }
 0x1c3   : > { %v1100_v52 = vmul.f32 %v959_v50, %v908_v46  ;;  %v1108_v53 = vmul.f32 %v999_v51, %v916_v47 }
 0x1c5   : > { %2066 = vmatmul.msk.f32.gmra.mxu0 %vm1132_vm1, %v1100_v52  ;;  %2074 = vmatmul.msk.f32.gmra.mxu1 %vm1132_vm1, %v1108_v53 }
 0x1c6   : > { %2083 = vmatmul.msk.f32.gmra.mxu2 %vm1132_vm1, %v1117_v54 }
 0x1ca   : > { %v1084_v59 = vpop.permute.xlu0 %1083  ;;  %v964_v60 = vpop.permute.xlu1 %963 }
 0x1cb   : > { %v1125_v62 = vmul.f32 %v1084_v59, %v933_v57  ;;  %v1101_v63 = vmul.f32 %v964_v60, %v909_v58 }
 0x1cd   : > { %2067 = vmatmul.msk.f32.gmra.mxu0 %vm1132_vm1, %v1101_v63  ;;  %2075 = vmatmul.msk.f32.gmra.mxu1 %vm1132_vm1, %v1109_v61 }
 0x1ce   : > { %2091 = vmatmul.msk.f32.gmra.mxu3 %vm1132_vm1, %v1125_v62 }
 0x1d2   : > { %v1049_v4 = vpop.permute.xlu0 %1048  ;;  %v1089_v5 = vpop.permute.xlu1 %1088 }
 0x1d3   : > { %v1118_v7 = vmul.f32 %v1049_v4, %v926_v2  ;;  %v1126_v8 = vmul.f32 %v1089_v5, %v934_v3 }
 0x1d5   : > { %2068 = vmatmul.msk.f32.gmra.mxu0 %vm1132_vm1, %v1102_v6  ;;  %2084 = vmatmul.msk.f32.gmra.mxu2 %vm1132_vm1, %v1118_v7 }
 0x1d6   : > { %2092 = vmatmul.msk.f32.gmra.mxu3 %vm1132_vm1, %v1126_v8 }
 0x1da   : > { %v1009_v13 = vpop.permute.xlu0 %1008  ;;  %v1054_v14 = vpop.permute.xlu1 %1053 }
 0x1db   : > { %v1110_v15 = vmul.f32 %v1009_v13, %v918_v9  ;;  %v1119_v16 = vmul.f32 %v1054_v14, %v927_v10 }
 0x1dd   : > { %2076 = vmatmul.msk.f32.gmra.mxu1 %vm1132_vm1, %v1110_v15  ;;  %2085 = vmatmul.msk.f32.gmra.mxu2 %vm1132_vm1, %v1119_v16 }
 0x1de   : > { %2093 = vmatmul.msk.f32.gmra.mxu3 %vm1132_vm1, %v1127_v17 }
 0x1e2   : > { %v974_v19 = vpop.permute.xlu0 %973  ;;  %v1014_v20 = vpop.permute.xlu1 %1013 }
 0x1e3   : > { %v1103_v21 = vmul.f32 %v974_v19, %v911_v18  ;;  %v1111_v22 = vmul.f32 %v1014_v20, %v919_v49 }
 0x1e5   : > { %2069 = vmatmul.msk.f32.gmra.mxu0 %vm1132_vm1, %v1103_v21  ;;  %2077 = vmatmul.msk.f32.gmra.mxu1 %vm1132_vm1, %v1111_v22 }
 0x212   : > { %v1246_v23 = vpop.f32.mrf.mxu0 }
 0x213   : > { %v1342_v24 = vpack.c.bf16 %v1246_v23, %v1246_v23 }
 0x215   : > { %1375 = vst.msk [vmem:[#allocation3] sm:$0xf] %vm1374_vm2, %v1342_v24 }
 0x218   : > { %v1294_v25 = vpop.f32.mrf.mxu2 }
 0x219   : > { %v1358_v26 = vpack.c.bf16 %v1294_v25, %v1294_v25 }
 0x21a   : > { %v1270_v27 = vpop.f32.mrf.mxu1 }
 0x21b   : > { %1391 = vst.msk [vmem:[#allocation3 + $0x40] sm:$0xf] %vm1374_vm2, %v1358_v26  ;;  %v1350_v28 = vpack.c.bf16 %v1270_v27, %v1270_v27 }
 0x21d   : > { %1383 = vst.msk [vmem:[#allocation3 + $0x20] sm:$0xf] %vm1374_vm2, %v1350_v28 }
 0x220   : > { %v1297_v29 = vpop.f32.mrf.mxu2 }
 0x221   : > { %v1359_v30 = vpack.c.bf16 %v1297_v29, %v1297_v29  ;;  %v1318_v31 = vpop.f32.mrf.mxu3 }
 0x222   : > { %v1366_v32 = vpack.c.bf16 %v1318_v31, %v1318_v31  ;;  %v1249_v33 = vpop.f32.mrf.mxu0  ;;  %v1273_v34 = vpop.f32.mrf.mxu1 }
 0x223   : > { %1392 = vst.msk [vmem:[#allocation3 + $0x44] sm:$0xf] %vm1374_vm2, %v1359_v30  ;;  %v1343_v35 = vpack.c.bf16 %v1249_v33, %v1249_v33  ;;  %v1351_v36 = vpack.c.bf16 %v1273_v34, %v1273_v34 }
 0x224   : > { %1399 = vst.msk [vmem:[#allocation3 + $0x60] sm:$0xf] %vm1374_vm2, %v1366_v32 }
 0x225   : > { %1376 = vst.msk [vmem:[#allocation3 + $0x4] sm:$0xf] %vm1374_vm2, %v1343_v35 }
 0x226   : > { %1384 = vst.msk [vmem:[#allocation3 + $0x24] sm:$0xf] %vm1374_vm2, %v1351_v36 }
 0x229   : > { %v1300_v37 = vpop.f32.mrf.mxu2  ;;  %v1321_v38 = vpop.f32.mrf.mxu3 }
 0x22a   : > { %v1360_v39 = vpack.c.bf16 %v1300_v37, %v1300_v37  ;;  %v1367_v40 = vpack.c.bf16 %v1321_v38, %v1321_v38  ;;  %v1252_v41 = vpop.f32.mrf.mxu0  ;;  %v1276_v42 = vpop.f32.mrf.mxu1 }
 0x22b   : > { %v1344_v43 = vpack.c.bf16 %v1252_v41, %v1252_v41  ;;  %v1352_v44 = vpack.c.bf16 %v1276_v42, %v1276_v42 }
 0x22c   : > { %1393 = vst.msk [vmem:[#allocation3 + $0x48] sm:$0xf] %vm1374_vm2, %v1360_v39 }
 0x22d   : > { %1400 = vst.msk [vmem:[#allocation3 + $0x64] sm:$0xf] %vm1374_vm2, %v1367_v40 }
 0x22e   : > { %1377 = vst.msk [vmem:[#allocation3 + $0x8] sm:$0xf] %vm1374_vm2, %v1344_v43 }
 0x22f   : > { %1385 = vst.msk [vmem:[#allocation3 + $0x28] sm:$0xf] %vm1374_vm2, %v1352_v44 }
 0x231   : > { %v1324_v45 = vpop.f32.mrf.mxu3 }
 0x232   : > { %v1368_v46 = vpack.c.bf16 %v1324_v45, %v1324_v45  ;;  %v1255_v47 = vpop.f32.mrf.mxu0 }
 0x233   : > { %v1345_v48 = vpack.c.bf16 %v1255_v47, %v1255_v47 }
 0x234   : > { %1401 = vst.msk [vmem:[#allocation3 + $0x68] sm:$0xf] %vm1374_vm2, %v1368_v46 }
 0x235   : > { %1378 = vst.msk [vmem:[#allocation3 + $0xc] sm:$0xf] %vm1374_vm2, %v1345_v48 }
 0x238   : > { %v1303_v50 = vpop.f32.mrf.mxu2 }
 0x239   : > { %v1361_v51 = vpack.c.bf16 %v1303_v50, %v1303_v50  ;;  %v1327_v52 = vpop.f32.mrf.mxu3 }
 0x23a   : > { %v1369_v53 = vpack.c.bf16 %v1327_v52, %v1327_v52  ;;  %v1279_v54 = vpop.f32.mrf.mxu1 }
 0x23b   : > { %1394 = vst.msk [vmem:[#allocation3 + $0x4c] sm:$0xf] %vm1374_vm2, %v1361_v51  ;;  %v1353_v55 = vpack.c.bf16 %v1279_v54, %v1279_v54 }
 0x23c   : > { %1402 = vst.msk [vmem:[#allocation3 + $0x6c] sm:$0xf] %vm1374_vm2, %v1369_v53 }
 0x23d   : > { %1386 = vst.msk [vmem:[#allocation3 + $0x2c] sm:$0xf] %vm1374_vm2, %v1353_v55 }
 0x240   : > { %v1306_v56 = vpop.f32.mrf.mxu2 }
 0x241   : > { %v1362_v57 = vpack.c.bf16 %v1306_v56, %v1306_v56  ;;  %v1330_v58 = vpop.f32.mrf.mxu3 }
 0x242   : > { %v1370_v59 = vpack.c.bf16 %v1330_v58, %v1330_v58  ;;  %v1258_v60 = vpop.f32.mrf.mxu0  ;;  %v1282_v61 = vpop.f32.mrf.mxu1 }
 0x243   : > { %1395 = vst.msk [vmem:[#allocation3 + $0x50] sm:$0xf] %vm1374_vm2, %v1362_v57  ;;  %v1346_v62 = vpack.c.bf16 %v1258_v60, %v1258_v60  ;;  %v1354_v63 = vpack.c.bf16 %v1282_v61, %v1282_v61 }
 0x244   : > { %1403 = vst.msk [vmem:[#allocation3 + $0x70] sm:$0xf] %vm1374_vm2, %v1370_v59 }
 0x245   : > { %1379 = vst.msk [vmem:[#allocation3 + $0x10] sm:$0xf] %vm1374_vm2, %v1346_v62 }
 0x246   : > { %1387 = vst.msk [vmem:[#allocation3 + $0x30] sm:$0xf] %vm1374_vm2, %v1354_v63 }
 0x249   : > { %v1309_v0 = vpop.f32.mrf.mxu2 }
 0x24a   : > { %v1363_v1 = vpack.c.bf16 %v1309_v0, %v1309_v0  ;;  %v1261_v2 = vpop.f32.mrf.mxu0  ;;  %v1285_v3 = vpop.f32.mrf.mxu1 }
 0x24b   : > { %v1347_v4 = vpack.c.bf16 %v1261_v2, %v1261_v2  ;;  %v1355_v5 = vpack.c.bf16 %v1285_v3, %v1285_v3 }
 0x24c   : > { %1396 = vst.msk [vmem:[#allocation3 + $0x54] sm:$0xf] %vm1374_vm2, %v1363_v1 }
 0x24d   : > { %1380 = vst.msk [vmem:[#allocation3 + $0x14] sm:$0xf] %vm1374_vm2, %v1347_v4 }
 0x24e   : > { %1388 = vst.msk [vmem:[#allocation3 + $0x34] sm:$0xf] %vm1374_vm2, %v1355_v5 }
 0x251   : > { %v1333_v6 = vpop.f32.mrf.mxu3 }
 0x252   : > { %v1371_v7 = vpack.c.bf16 %v1333_v6, %v1333_v6  ;;  %v1264_v8 = vpop.f32.mrf.mxu0 }
 0x253   : > { %v1348_v9 = vpack.c.bf16 %v1264_v8, %v1264_v8 }
 0x254   : > { %1404 = vst.msk [vmem:[#allocation3 + $0x74] sm:$0xf] %vm1374_vm2, %v1371_v7 }
 0x255   : > { %1381 = vst.msk [vmem:[#allocation3 + $0x18] sm:$0xf] %vm1374_vm2, %v1348_v9 }
 0x258   : > { %v1312_v10 = vpop.f32.mrf.mxu2 }
 0x259   : > { %v1364_v11 = vpack.c.bf16 %v1312_v10, %v1312_v10  ;;  %v1336_v12 = vpop.f32.mrf.mxu3 }
 0x25a   : > { %v1372_v13 = vpack.c.bf16 %v1336_v12, %v1336_v12  ;;  %v1288_v14 = vpop.f32.mrf.mxu1 }
 0x25b   : > { %1397 = vst.msk [vmem:[#allocation3 + $0x58] sm:$0xf] %vm1374_vm2, %v1364_v11  ;;  %v1356_v15 = vpack.c.bf16 %v1288_v14, %v1288_v14 }
 0x25c   : > { %1405 = vst.msk [vmem:[#allocation3 + $0x78] sm:$0xf] %vm1374_vm2, %v1372_v13 }
 0x25d   : > { %1389 = vst.msk [vmem:[#allocation3 + $0x38] sm:$0xf] %vm1374_vm2, %v1356_v15 }
 0x260   : > { %v1315_v16 = vpop.f32.mrf.mxu2 }
 0x261   : > { %v1365_v17 = vpack.c.bf16 %v1315_v16, %v1315_v16  ;;  %v1339_v18 = vpop.f32.mrf.mxu3 }
 0x262   : > { %v1373_v49 = vpack.c.bf16 %v1339_v18, %v1339_v18  ;;  %v1267_v19 = vpop.f32.mrf.mxu0  ;;  %v1291_v20 = vpop.f32.mrf.mxu1 }
 0x263   : > { %1398 = vst.msk [vmem:[#allocation3 + $0x5c] sm:$0xf] %vm1374_vm2, %v1365_v17  ;;  %v1349_v21 = vpack.c.bf16 %v1267_v19, %v1267_v19  ;;  %v1357_v22 = vpack.c.bf16 %v1291_v20, %v1291_v20 }
 0x264   : > { %1406 = vst.msk [vmem:[#allocation3 + $0x7c] sm:$0xf] %vm1374_vm2, %v1373_v49 }
 0x265   : > { %1382 = vst.msk [vmem:[#allocation3 + $0x1c] sm:$0xf] %vm1374_vm2, %v1349_v21 }
 0x266   : > { %1390 = vst.msk [vmem:[#allocation3 + $0x3c] sm:$0xf] %vm1374_vm2, %v1357_v22 }
 0x267 PF: > { %p2094_p5 = scmp.ne.s32.totalorder %s2393_s19, 0 }
 0x269   : > { %1409 = sbr.rel (%p2094_p5) target bundleno = 639 (0x27f), region = 117 }
 0x26e   : > { %vm1410_vm3 = vcmask 261120   ;;  %v2421_v23 = vmov 0.0  }
 0x26f   : > { %1411 = vst.msk [vmem:[#allocation2] sm:$0xff] %vm1410_vm3, %v2421_v23 }
 0x270   : > { %1412 = vst.msk [vmem:[#allocation2 + $0x8] sm:$0xff] %vm1410_vm3, %v2421_v23 }
 0x271   : > { %1413 = vst.msk [vmem:[#allocation2 + $0x10] sm:$0xff] %vm1410_vm3, %v2421_v23 }
 0x272   : > { %1414 = vst.msk [vmem:[#allocation2 + $0x18] sm:$0xff] %vm1410_vm3, %v2421_v23 }
 0x273   : > { %1415 = vst.msk [vmem:[#allocation2 + $0x20] sm:$0xff] %vm1410_vm3, %v2421_v23 }
 0x274   : > { %1416 = vst.msk [vmem:[#allocation2 + $0x28] sm:$0xff] %vm1410_vm3, %v2421_v23 }
 0x275   : > { %1417 = vst.msk [vmem:[#allocation2 + $0x30] sm:$0xff] %vm1410_vm3, %v2421_v23 }
 0x276   : > { %1418 = vst.msk [vmem:[#allocation2 + $0x38] sm:$0xff] %vm1410_vm3, %v2421_v23 }
 0x277   : > { %1419 = vst.msk [vmem:[#allocation2 + $0x40] sm:$0xff] %vm1410_vm3, %v2421_v23 }
 0x278   : > { %1420 = vst.msk [vmem:[#allocation2 + $0x48] sm:$0xff] %vm1410_vm3, %v2421_v23 }
 0x279   : > { %1421 = vst.msk [vmem:[#allocation2 + $0x50] sm:$0xff] %vm1410_vm3, %v2421_v23 }
 0x27a   : > { %1422 = vst.msk [vmem:[#allocation2 + $0x58] sm:$0xff] %vm1410_vm3, %v2421_v23 }
 0x27b   : > { %1423 = vst.msk [vmem:[#allocation2 + $0x60] sm:$0xff] %vm1410_vm3, %v2421_v23 }
 0x27c   : > { %1424 = vst.msk [vmem:[#allocation2 + $0x68] sm:$0xff] %vm1410_vm3, %v2421_v23 }
 0x27d   : > { %1425 = vst.msk [vmem:[#allocation2 + $0x70] sm:$0xff] %vm1410_vm3, %v2421_v23 }
 0x27e   : > { %1426 = vst.msk [vmem:[#allocation2 + $0x78] sm:$0xff] %vm1410_vm3, %v2421_v23 }
 0x27f PF: > { %s2095_s30 = sshll.u32 %s2393_s19, 7  ;;  %v2169_v32 = vld [vmem:[%s2594_s27] sm:$0xff]  ;;  %v2171_v33 = vld [vmem:[%s2594_s27 + $0x10] sm:$0xff]  ;;  %v2170_v36 = vld [vmem:[%s2594_s27 + $0x8] sm:$0xff]  ;;  %p1658_p6 = scmp.eq.s32.totalorder %s2393_s19, 1  ;;  %vm1641_vm4 = vcmask 261120  }
 0x280   : > { %s1460_s26 = sshra.s32 %s2095_s30, 3  ;;  %v2173_v34 = vld [vmem:[%s2594_s27 + $0x20] sm:$0xff]  ;;  %v2175_v35 = vld [vmem:[%s2594_s27 + $0x30] sm:$0xff]  ;;  %v2172_v37 = vld [vmem:[%s2594_s27 + $0x18] sm:$0xff]  ;;  %p2161_p7 = scmp.ne.s32.totalorder %s2393_s19, 1 }
 0x281   : > { %s2096_s0 = sshll.u32 %s1460_s26, 2  ;;  %v2174_v38 = vld [vmem:[%s2594_s27 + $0x28] sm:$0xff]  ;;  %v2176_v39 = vld [vmem:[%s2594_s27 + $0x38] sm:$0xff]  ;;  %v1428_v40 = vld [vmem:[#allocation2] sm:$0xff]  ;;  %s2162_s27 = sshll.u32 (!%p2161_p7), %s2397_s20, 7 }
 0x282   : > { %s3053_s29 = scalar_lea.vmem [#allocation3], %s2096_s0  ;;  %v1432_v41 = vld [vmem:[#allocation2 + $0x20] sm:$0xff]  ;;  %v1429_v48 = vld [vmem:[#allocation2 + $0x8] sm:$0xff]  ;;  %v1430_v61 = vld [vmem:[#allocation2 + $0x10] sm:$0xff]  ;;  %s3095_s17 = scalar_lea.vmem (!%p2161_p7), %s3234_s3, %s2162_s27 }
 0x283   : > { %v2184_v24 = vld [vmem:[%s3053_s29 + $0x38] sm:$0xff]  ;;  %v2183_v25 = vld [vmem:[%s3053_s29 + $0x30] sm:$0xff]  ;;  %v2182_v26 = vld [vmem:[%s3053_s29 + $0x28] sm:$0xff]  ;;  %s3126_s26 = scalar_lea.vmem (!%p2161_p7), [#allocation4], %s2162_s27 }
 0x284   : > { %1576 = vmatpush.bf16.msra.mxu0 %v2184_v24  ;;  %2197 = vmatpush.bf16.msra.mxu1 %v2184_v24  ;;  %v2181_v27 = vld [vmem:[%s3053_s29 + $0x20] sm:$0xff]  ;;  %v2180_v28 = vld [vmem:[%s3053_s29 + $0x18] sm:$0xff]  ;;  %v2179_v29 = vld [vmem:[%s3053_s29 + $0x10] sm:$0xff] }
 0x285   : > { %2198 = vmatpush.bf16.msra.mxu2 %v2184_v24  ;;  %2199 = vmatpush.bf16.msra.mxu3 %v2184_v24  ;;  %v2178_v30 = vld [vmem:[%s3053_s29 + $0x8] sm:$0xff]  ;;  %v2177_v31 = vld [vmem:[%s3053_s29] sm:$0xff]  ;;  %v1433_v50 = vld [vmem:[#allocation2 + $0x28] sm:$0xff] }
 0x286   : > { %v1436_v46 = vld [vmem:[#allocation2 + $0x40] sm:$0xff]  ;;  %v1437_v59 = vld [vmem:[#allocation2 + $0x48] sm:$0xff]  ;;  %v1434_v62 = vld [vmem:[#allocation2 + $0x30] sm:$0xff] }
 0x287   : > { %v1440_v47 = vld [vmem:[#allocation2 + $0x60] sm:$0xff]  ;;  %v1441_v60 = vld [vmem:[#allocation2 + $0x68] sm:$0xff]  ;;  %v1438_v7 = vld [vmem:[#allocation2 + $0x50] sm:$0xff] }
 0x288   : > { %1577 = vmatpush.bf16.msra.mxu0 %v2183_v25  ;;  %2200 = vmatpush.bf16.msra.mxu1 %v2183_v25  ;;  %v1442_v8 = vld [vmem:[#allocation2 + $0x70] sm:$0xff]  ;;  %v1431_v9 = vld [vmem:[#allocation2 + $0x18] sm:$0xff] }
 0x289   : > { %2201 = vmatpush.bf16.msra.mxu2 %v2183_v25  ;;  %2202 = vmatpush.bf16.msra.mxu3 %v2183_v25  ;;  %v1435_v10 = vld [vmem:[#allocation2 + $0x38] sm:$0xff] }
 0x28a   : > { %v1439_v49 = vld [vmem:[#allocation2 + $0x58] sm:$0xff] }
 0x28b   : > { %v1443_v19 = vld [vmem:[#allocation2 + $0x78] sm:$0xff] }
 0x28c   : > { %1578 = vmatpush.bf16.msra.mxu0 %v2182_v26  ;;  %2203 = vmatpush.bf16.msra.mxu1 %v2182_v26 }
 0x28d   : > { %2204 = vmatpush.bf16.msra.mxu2 %v2182_v26  ;;  %2205 = vmatpush.bf16.msra.mxu3 %v2182_v26 }
 0x290   : > { %1579 = vmatpush.bf16.msra.mxu0 %v2181_v27  ;;  %2206 = vmatpush.bf16.msra.mxu1 %v2181_v27 }
 0x291   : > { %2207 = vmatpush.bf16.msra.mxu2 %v2181_v27  ;;  %2208 = vmatpush.bf16.msra.mxu3 %v2181_v27 }
 0x294   : > { %1580 = vmatpush.bf16.msra.mxu0 %v2180_v28  ;;  %2209 = vmatpush.bf16.msra.mxu1 %v2180_v28 }
 0x295   : > { %2210 = vmatpush.bf16.msra.mxu2 %v2180_v28  ;;  %2211 = vmatpush.bf16.msra.mxu3 %v2180_v28 }
 0x298   : > { %1581 = vmatpush.bf16.msra.mxu0 %v2179_v29  ;;  %2212 = vmatpush.bf16.msra.mxu1 %v2179_v29 }
 0x299   : > { %2213 = vmatpush.bf16.msra.mxu2 %v2179_v29  ;;  %2214 = vmatpush.bf16.msra.mxu3 %v2179_v29 }
 0x29c   : > { %1582 = vmatpush.bf16.msra.mxu0 %v2178_v30  ;;  %2215 = vmatpush.bf16.msra.mxu1 %v2178_v30 }
 0x29d   : > { %2216 = vmatpush.bf16.msra.mxu2 %v2178_v30  ;;  %2217 = vmatpush.bf16.msra.mxu3 %v2178_v30 }
 0x2a0   : > { %1583 = vmatpush.bf16.msra.mxu0 %v2177_v31  ;;  %2218 = vmatpush.bf16.msra.mxu1 %v2177_v31 }
 0x2a1   : > { %2219 = vmatpush.bf16.msra.mxu2 %v2177_v31  ;;  %2220 = vmatpush.bf16.msra.mxu3 %v2177_v31 }
 0x2a3   : > { %1584 = vmatmul.bf16.vlgmr.msra.gmra.mxu0 %v2169_v32  ;;  %1594 = vmatmul.bf16.vlgmr.msra.gmra.mxu1 %v2171_v33 }
 0x2a4   : > { %1604 = vmatmul.bf16.vlgmr.msra.gmra.mxu2 %v2173_v34  ;;  %1614 = vmatmul.bf16.vlgmr.msra.gmra.mxu3 %v2175_v35 }
 0x2b3   : > { %1589 = vmatmul.bf16.gmra.mxu0 %v2170_v36  ;;  %1599 = vmatmul.bf16.gmra.mxu1 %v2172_v37 }
 0x2b4   : > { %1609 = vmatmul.bf16.gmra.mxu2 %v2174_v38  ;;  %1619 = vmatmul.bf16.gmra.mxu3 %v2176_v39 }
 0x320   : > { %v1585_v42 = vpop.f32.mrf.mxu0  ;;  %v1595_v43 = vpop.f32.mrf.mxu1 }
 0x321   : > { %v1625_v44 = vadd.f32 %v1585_v42, %v1428_v40  ;;  %v1629_v45 = vadd.f32 %v1595_v43, %v1432_v41 }
 0x323   : > { %1642 = vst.msk [vmem:[#allocation2] sm:$0xff] %vm1641_vm4, %v1625_v44 }
 0x324   : > { %1646 = vst.msk [vmem:[#allocation2 + $0x20] sm:$0xff] %vm1641_vm4, %v1629_v45 }
 0x327   : > { %v1605_v51 = vpop.f32.mrf.mxu2  ;;  %v1615_v52 = vpop.f32.mrf.mxu3 }
 0x328   : > { %v1633_v53 = vadd.f32 %v1605_v51, %v1436_v46  ;;  %v1637_v54 = vadd.f32 %v1615_v52, %v1440_v47  ;;  %v1587_v55 = vpop.f32.mrf.mxu0  ;;  %v1597_v56 = vpop.f32.mrf.mxu1 }
 0x329   : > { %v1626_v57 = vadd.f32 %v1587_v55, %v1429_v48  ;;  %v1630_v58 = vadd.f32 %v1597_v56, %v1433_v50 }
 0x32a   : > { %1650 = vst.msk [vmem:[#allocation2 + $0x40] sm:$0xff] %vm1641_vm4, %v1633_v53 }
 0x32b   : > { %1654 = vst.msk [vmem:[#allocation2 + $0x60] sm:$0xff] %vm1641_vm4, %v1637_v54 }
 0x32c   : > { %1643 = vst.msk [vmem:[#allocation2 + $0x8] sm:$0xff] %vm1641_vm4, %v1626_v57 }
 0x32d   : > { %1647 = vst.msk [vmem:[#allocation2 + $0x28] sm:$0xff] %vm1641_vm4, %v1630_v58 }
 0x32f   : > { %v1607_v63 = vpop.f32.mrf.mxu2  ;;  %v1617_v0 = vpop.f32.mrf.mxu3 }
 0x330   : > { %v1634_v1 = vadd.f32 %v1607_v63, %v1437_v59  ;;  %v1638_v2 = vadd.f32 %v1617_v0, %v1441_v60  ;;  %v1590_v3 = vpop.f32.mrf.mxu0  ;;  %v1600_v4 = vpop.f32.mrf.mxu1 }
 0x331   : > { %v1627_v5 = vadd.f32 %v1590_v3, %v1430_v61  ;;  %v1631_v6 = vadd.f32 %v1600_v4, %v1434_v62 }
 0x332   : > { %1651 = vst.msk [vmem:[#allocation2 + $0x48] sm:$0xff] %vm1641_vm4, %v1634_v1 }
 0x333   : > { %1655 = vst.msk [vmem:[#allocation2 + $0x68] sm:$0xff] %vm1641_vm4, %v1638_v2 }
 0x334   : > { %1644 = vst.msk [vmem:[#allocation2 + $0x10] sm:$0xff] %vm1641_vm4, %v1627_v5 }
 0x335   : > { %1648 = vst.msk [vmem:[#allocation2 + $0x30] sm:$0xff] %vm1641_vm4, %v1631_v6 }
 0x337   : > { %v1610_v11 = vpop.f32.mrf.mxu2  ;;  %v1620_v12 = vpop.f32.mrf.mxu3 }
 0x338   : > { %v1635_v13 = vadd.f32 %v1610_v11, %v1438_v7  ;;  %v1639_v14 = vadd.f32 %v1620_v12, %v1442_v8  ;;  %v1592_v15 = vpop.f32.mrf.mxu0  ;;  %v1602_v16 = vpop.f32.mrf.mxu1 }
 0x339   : > { %v1628_v17 = vadd.f32 %v1592_v15, %v1431_v9  ;;  %v1632_v18 = vadd.f32 %v1602_v16, %v1435_v10 }
 0x33a   : > { %1652 = vst.msk [vmem:[#allocation2 + $0x50] sm:$0xff] %vm1641_vm4, %v1635_v13 }
 0x33b   : > { %1656 = vst.msk [vmem:[#allocation2 + $0x70] sm:$0xff] %vm1641_vm4, %v1639_v14 }
 0x33c   : > { %1645 = vst.msk [vmem:[#allocation2 + $0x18] sm:$0xff] %vm1641_vm4, %v1628_v17 }
 0x33d   : > { %1649 = vst.msk [vmem:[#allocation2 + $0x38] sm:$0xff] %vm1641_vm4, %v1632_v18 }
 0x33f   : > { %v1612_v20 = vpop.f32.mrf.mxu2  ;;  %v1622_v21 = vpop.f32.mrf.mxu3  ;;  %1661 = sbr.rel (%p2161_p7) target bundleno = 1001 (0x3e9), region = 121 }
 0x340   : > { %v1636_v22 = vadd.f32 %v1612_v20, %v1439_v49  ;;  %v1640_v23 = vadd.f32 %v1622_v21, %v1443_v19 }
 0x342   : > { %1653 = vst.msk [vmem:[#allocation2 + $0x58] sm:$0xff] %vm1641_vm4, %v1636_v22 }
 0x343   : > { %1657 = vst.msk [vmem:[#allocation2 + $0x78] sm:$0xff] %vm1641_vm4, %v1640_v23 }
 0x344   : > { %v2422_v24 = vmov 0   ;;  %v1668_v25 = vld [vmem:[%s3095_s17 + $0x20] sm:$0xff]  ;;  %v1666_v26 = vld [vmem:[%s3095_s17 + $0x10] sm:$0xff]  ;;  %v1669_v28 = vld [vmem:[%s3095_s17 + $0x28] sm:$0xff]  ;;  %s1680_s28 = scalar_select %p505_p0, 1, 0 }
 0x345   : > { %2313 = vset.pattern.permute.xlu2 %v2422_v24  ;;  %2312 = vset.pattern.permute.xlu1 %v2422_v24  ;;  %v1664_v27 = vld [vmem:[%s3095_s17] sm:$0xff]  ;;  %v1667_v29 = vld [vmem:[%s3095_s17 + $0x18] sm:$0xff]  ;;  %v1665_v30 = vld [vmem:[%s3095_s17 + $0x8] sm:$0xff] }
 0x346   : > { %2311 = vset.pattern.permute.xlu0 %v2422_v24  ;;  %1728 = vperm.xlu2 %2313, %v1668_v25   ;;  %v1672_v31 = vld [vmem:[%s3095_s17 + $0x40] sm:$0xff]  ;;  %v1671_v32 = vld [vmem:[%s3095_s17 + $0x38] sm:$0xff]  ;;  %v1670_v33 = vld [vmem:[%s3095_s17 + $0x30] sm:$0xff]  ;;  %s1681_s12 = scvt.s32.f32 %s1680_s28 }
 0x347   : > { %1718 = vperm.xlu1 %2312, %v1666_v26   ;;  %1708 = vperm.xlu0 %2311, %v1664_v27   ;;  %v1675_v34 = vld [vmem:[%s3095_s17 + $0x58] sm:$0xff]  ;;  %v1674_v35 = vld [vmem:[%s3095_s17 + $0x50] sm:$0xff]  ;;  %v1673_v36 = vld [vmem:[%s3095_s17 + $0x48] sm:$0xff] }
 0x348   : > { %v1678_v37 = vld [vmem:[%s3095_s17 + $0x70] sm:$0xff]  ;;  %v1677_v38 = vld [vmem:[%s3095_s17 + $0x68] sm:$0xff]  ;;  %v1676_v39 = vld [vmem:[%s3095_s17 + $0x60] sm:$0xff]  ;;  %s1685_s13 = ssub.f32 1.0, %s1681_s12  ;;  %v1683_v42 = vstv %s1681_s12 }
 0x349   : > { %v1679_v40 = vld [vmem:[%s3095_s17 + $0x78] sm:$0xff]  ;;  %v1682_v41 = vld [vmem:[%s3237_s6] sm:$0x1]  ;;  %v1694_v48 = vld [vmem:[#allocation2 + $0x20] sm:$0xff] }
 0x34a   : > { %v1686_v43 = vld [vmem:[%s3239_s8] sm:$0x1]  ;;  %v1687_v44 = vstv %s1685_s13  ;;  %v1684_v45 = vmul.f32 %v1683_v42, %v1682_v41  ;;  %v1695_v55 = vld [vmem:[#allocation2 + $0x28] sm:$0xff]  ;;  %v1698_v60 = vld [vmem:[#allocation2 + $0x40] sm:$0xff] }
 0x34b   : > { %v1688_v46 = vmul.f32 %v1687_v44, %v1686_v43  ;;  %v1701_v1 = vld [vmem:[#allocation2 + $0x58] sm:$0xff]  ;;  %v1692_v2 = vld [vmem:[#allocation2 + $0x10] sm:$0xff]  ;;  %v1690_v3 = vld [vmem:[#allocation2] sm:$0xff] }
 0x34c   : > { %v1704_v16 = vld [vmem:[#allocation2 + $0x70] sm:$0xff]  ;;  %v1693_v17 = vld [vmem:[#allocation2 + $0x18] sm:$0xff]  ;;  %v1691_v18 = vld [vmem:[#allocation2 + $0x8] sm:$0xff] }
 0x34d   : > { %v1689_v47 = vadd.f32 %v1688_v46, %v1684_v45  ;;  %v1699_v41 = vld [vmem:[#allocation2 + $0x48] sm:$0xff] }
 0x34e   : > { %1733 = vperm.xlu2 %2313, %v1669_v28  }
 0x34f   : > { %1723 = vperm.xlu1 %2312, %v1667_v29   ;;  %1713 = vperm.xlu0 %2311, %v1665_v30   ;;  %v3121_v51 = vperm.slane %v1689_v47, 0  ;;  %v1697_v30 = vld [vmem:[#allocation2 + $0x38] sm:$0xff] }
 0x356   : > { %1748 = vperm.xlu2 %2313, %v1672_v31   ;;  %v1696_v31 = vld [vmem:[#allocation2 + $0x30] sm:$0xff] }
 0x357   : > { %1743 = vperm.xlu1 %2312, %v1671_v32   ;;  %1738 = vperm.xlu0 %2311, %v1670_v33  }
 0x35e   : > { %1763 = vperm.xlu2 %2313, %v1675_v34  }
 0x35f   : > { %1758 = vperm.xlu1 %2312, %v1674_v35   ;;  %1753 = vperm.xlu0 %2311, %v1673_v36  }
 0x366   : > { %1778 = vperm.xlu2 %2313, %v1678_v37  }
 0x367   : > { %1773 = vperm.xlu1 %2312, %v1677_v38   ;;  %1768 = vperm.xlu0 %2311, %v1676_v39  }
 0x36f   : > { %1783 = vperm.xlu0 %2311, %v1679_v40   ;;  %v1700_v40 = vld [vmem:[#allocation2 + $0x50] sm:$0xff] }
 0x3a0   : > { %v1729_v50 = vpop.permute.xlu2 %1728 }
 0x3a1   : > { %v1790_v52 = vmul.f32 %v1729_v50, %v1694_v48 }
 0x3a3   : > { %v1809_v53 = vadd.f32 %v3121_v51, %v1790_v52  ;;  %v1703_v52 = vld [vmem:[#allocation2 + $0x68] sm:$0xff] }
 0x3a5   : > { %v1825_v54 = vmax.f32 %v1809_v53, 0.0  ;;  %v1702_v53 = vld [vmem:[#allocation2 + $0x60] sm:$0xff] }
 0x3a7   : > { %1842 = vst.msk [vmem:[%s3126_s26 + $0x20] sm:$0xff] %vm1641_vm4, %v1825_v54 }
 0x3a8   : > { %v1734_v56 = vpop.permute.xlu2 %1733 }
 0x3a9   : > { %v1791_v57 = vmul.f32 %v1734_v56, %v1695_v55 }
 0x3ab   : > { %v1810_v58 = vadd.f32 %v3121_v51, %v1791_v57 }
 0x3ad   : > { %v1826_v59 = vmax.f32 %v1810_v58, 0.0 }
 0x3af   : > { %1843 = vst.msk [vmem:[%s3126_s26 + $0x28] sm:$0xff] %vm1641_vm4, %v1826_v59 }
 0x3b0   : > { %v1749_v61 = vpop.permute.xlu2 %1748 }
 0x3b1   : > { %v1794_v62 = vmul.f32 %v1749_v61, %v1698_v60 }
 0x3b3   : > { %v1813_v63 = vadd.f32 %v3121_v51, %v1794_v62  ;;  %v1705_v62 = vld [vmem:[#allocation2 + $0x78] sm:$0xff] }
 0x3b5   : > { %v1829_v0 = vmax.f32 %v1813_v63, 0.0 }
 0x3b7   : > { %1846 = vst.msk [vmem:[%s3126_s26 + $0x40] sm:$0xff] %vm1641_vm4, %v1829_v0 }
 0x3b8   : > { %v1764_v4 = vpop.permute.xlu2 %1763 }
 0x3b9   : > { %v1719_v5 = vpop.permute.xlu1 %1718  ;;  %v1797_v6 = vmul.f32 %v1764_v4, %v1701_v1  ;;  %v1709_v8 = vpop.permute.xlu0 %1708 }
 0x3ba   : > { %v1788_v7 = vmul.f32 %v1719_v5, %v1692_v2  ;;  %v1786_v9 = vmul.f32 %v1709_v8, %v1690_v3 }
 0x3bb   : > { %v1816_v10 = vadd.f32 %v3121_v51, %v1797_v6 }
 0x3bc   : > { %v1807_v11 = vadd.f32 %v3121_v51, %v1788_v7  ;;  %v1805_v12 = vadd.f32 %v3121_v51, %v1786_v9 }
 0x3bd   : > { %v1832_v13 = vmax.f32 %v1816_v10, 0.0 }
 0x3be   : > { %v1823_v14 = vmax.f32 %v1807_v11, 0.0  ;;  %v1821_v15 = vmax.f32 %v1805_v12, 0.0 }
 0x3bf   : > { %1849 = vst.msk [vmem:[%s3126_s26 + $0x58] sm:$0xff] %vm1641_vm4, %v1832_v13 }
 0x3c0   : > { %1840 = vst.msk [vmem:[%s3126_s26 + $0x10] sm:$0xff] %vm1641_vm4, %v1823_v14  ;;  %v1779_v49 = vpop.permute.xlu2 %1778 }
 0x3c1   : > { %v1724_v19 = vpop.permute.xlu1 %1723  ;;  %1838 = vst.msk [vmem:[%s3126_s26] sm:$0xff] %vm1641_vm4, %v1821_v15  ;;  %v1800_v20 = vmul.f32 %v1779_v49, %v1704_v16  ;;  %v1714_v22 = vpop.permute.xlu0 %1713 }
 0x3c2   : > { %v1789_v21 = vmul.f32 %v1724_v19, %v1693_v17  ;;  %v1787_v23 = vmul.f32 %v1714_v22, %v1691_v18 }
 0x3c3   : > { %v1819_v24 = vadd.f32 %v3121_v51, %v1800_v20 }
 0x3c4   : > { %v1808_v25 = vadd.f32 %v3121_v51, %v1789_v21  ;;  %v1806_v26 = vadd.f32 %v3121_v51, %v1787_v23 }
 0x3c5   : > { %v1835_v27 = vmax.f32 %v1819_v24, 0.0 }
 0x3c6   : > { %v1824_v28 = vmax.f32 %v1808_v25, 0.0  ;;  %v1822_v29 = vmax.f32 %v1806_v26, 0.0 }
 0x3c7   : > { %1852 = vst.msk [vmem:[%s3126_s26 + $0x70] sm:$0xff] %vm1641_vm4, %v1835_v27 }
 0x3c8   : > { %1841 = vst.msk [vmem:[%s3126_s26 + $0x18] sm:$0xff] %vm1641_vm4, %v1824_v28 }
 0x3c9   : > { %v1744_v32 = vpop.permute.xlu1 %1743  ;;  %1839 = vst.msk [vmem:[%s3126_s26 + $0x8] sm:$0xff] %vm1641_vm4, %v1822_v29  ;;  %v1739_v34 = vpop.permute.xlu0 %1738 }
 0x3ca   : > { %v1793_v33 = vmul.f32 %v1744_v32, %v1697_v30  ;;  %v1792_v35 = vmul.f32 %v1739_v34, %v1696_v31 }
 0x3cc   : > { %v1812_v36 = vadd.f32 %v3121_v51, %v1793_v33  ;;  %v1811_v37 = vadd.f32 %v3121_v51, %v1792_v35 }
 0x3ce   : > { %v1828_v38 = vmax.f32 %v1812_v36, 0.0  ;;  %v1827_v39 = vmax.f32 %v1811_v37, 0.0 }
 0x3d0   : > { %1845 = vst.msk [vmem:[%s3126_s26 + $0x38] sm:$0xff] %vm1641_vm4, %v1828_v38 }
 0x3d1   : > { %1844 = vst.msk [vmem:[%s3126_s26 + $0x30] sm:$0xff] %vm1641_vm4, %v1827_v39  ;;  %v1759_v42 = vpop.permute.xlu1 %1758  ;;  %v1754_v44 = vpop.permute.xlu0 %1753 }
 0x3d2   : > { %v1796_v43 = vmul.f32 %v1759_v42, %v1700_v40  ;;  %v1795_v45 = vmul.f32 %v1754_v44, %v1699_v41 }
 0x3d4   : > { %v1815_v46 = vadd.f32 %v3121_v51, %v1796_v43  ;;  %v1814_v47 = vadd.f32 %v3121_v51, %v1795_v45 }
 0x3d6   : > { %v1831_v48 = vmax.f32 %v1815_v46, 0.0  ;;  %v1830_v50 = vmax.f32 %v1814_v47, 0.0 }
 0x3d8   : > { %1848 = vst.msk [vmem:[%s3126_s26 + $0x50] sm:$0xff] %vm1641_vm4, %v1831_v48 }
 0x3d9   : > { %1847 = vst.msk [vmem:[%s3126_s26 + $0x48] sm:$0xff] %vm1641_vm4, %v1830_v50  ;;  %v1774_v54 = vpop.permute.xlu1 %1773  ;;  %v1769_v56 = vpop.permute.xlu0 %1768 }
 0x3da   : > { %v1799_v55 = vmul.f32 %v1774_v54, %v1703_v52  ;;  %v1798_v57 = vmul.f32 %v1769_v56, %v1702_v53 }
 0x3dc   : > { %v1818_v58 = vadd.f32 %v3121_v51, %v1799_v55  ;;  %v1817_v59 = vadd.f32 %v3121_v51, %v1798_v57 }
 0x3de   : > { %v1834_v60 = vmax.f32 %v1818_v58, 0.0  ;;  %v1833_v61 = vmax.f32 %v1817_v59, 0.0 }
 0x3e0   : > { %1851 = vst.msk [vmem:[%s3126_s26 + $0x68] sm:$0xff] %vm1641_vm4, %v1834_v60 }
 0x3e1   : > { %1850 = vst.msk [vmem:[%s3126_s26 + $0x60] sm:$0xff] %vm1641_vm4, %v1833_v61  ;;  %v1784_v63 = vpop.permute.xlu0 %1783 }
 0x3e2   : > { %v1801_v0 = vmul.f32 %v1784_v63, %v1705_v62 }
 0x3e4   : > { %v1820_v1 = vadd.f32 %v3121_v51, %v1801_v0 }
 0x3e6   : > { %v1836_v2 = vmax.f32 %v1820_v1, 0.0 }
 0x3e8   : > { %1853 = vst.msk [vmem:[%s3126_s26 + $0x78] sm:$0xff] %vm1641_vm4, %v1836_v2 }
 0x3e9 PF: > { %p1854_p8 = scmp.eq.s32.totalorder %s2397_s20, 1 }
 0x3eb   : > { %p1855_p9 = pnand %p1854_p8, %p867_p3 }
 0x3ed   : > { %p1856_p10 = pneg %p1855_p9 }
 0x3ef   : > { %p1857_p11 = pnand %p1856_p10, %p1658_p6 }
 0x3f0   : > { %s3255_s14 = sld [smem:[#allocation14_spill]] (!%p1857_p11) }
 0x3f1   : > { %1860 = sbr.rel (%p1857_p11) target bundleno = 1310 (0x51e), region = 125 }
 0x3f6   : > { %v1877_v3 = vld [vmem:[#allocation4 + $0x78] sm:$0xff]  ;;  %v1876_v5 = vld [vmem:[#allocation4 + $0x70] sm:$0xff]  ;;  %v1875_v6 = vld [vmem:[#allocation4 + $0x68] sm:$0xff]  ;;  %vm1971_vm5 = vcmask 25600  }
 0x3f7   : > { %v1893_v4 = vld [vmem:[#allocation4 + $0xf8] sm:$0xff]  ;;  %1900 = vmatpush.msra.mxu0 %v1877_v3  ;;  %v1892_v51 = vld [vmem:[#allocation4 + $0xf0] sm:$0xff]  ;;  %v1891_v7 = vld [vmem:[#allocation4 + $0xe8] sm:$0xff] }
 0x3f8   : > { %1920 = vmatpush.msra.mxu1 %v1893_v4  ;;  %v1874_v8 = vld [vmem:[#allocation4 + $0x60] sm:$0xff]  ;;  %v1873_v10 = vld [vmem:[#allocation4 + $0x58] sm:$0xff]  ;;  %v1872_v12 = vld [vmem:[#allocation4 + $0x50] sm:$0xff] }
 0x3f9   : > { %1901 = vmatpush.msra.mxu0 %v1876_v5  ;;  %v1890_v9 = vld [vmem:[#allocation4 + $0xe0] sm:$0xff]  ;;  %v1889_v11 = vld [vmem:[#allocation4 + $0xd8] sm:$0xff]  ;;  %v1888_v13 = vld [vmem:[#allocation4 + $0xd0] sm:$0xff] }
 0x3fa   : > { %1921 = vmatpush.msra.mxu1 %v1892_v51  ;;  %v1871_v14 = vld [vmem:[#allocation4 + $0x48] sm:$0xff]  ;;  %v1861_v16 = vld [vmem:[%s3232_s1] sm:$0xf]  ;;  %v1943_v17 = vld [vmem:[%s3240_s9 + $0x18] sm:$0xff] }
 0x3fb   : > { %1902 = vmatpush.msra.mxu0 %v1875_v6  ;;  %v1887_v15 = vld [vmem:[#allocation4 + $0xc8] sm:$0xff]  ;;  %1895 = vst [vmem:[#allocation1] ss:$4 sm:$0xff] %v1861_v16  ;;  %v1870_v49 = vld [vmem:[#allocation4 + $0x40] sm:$0xff]  ;;  %1963 = vmatpush.msra.mxu2 %v1943_v17  ;;  %v1869_v20 = vld [vmem:[#allocation4 + $0x38] sm:$0xff] }
 0x3fc   : > { %1922 = vmatpush.msra.mxu1 %v1891_v7  ;;  %v1942_v18 = vld [vmem:[%s3240_s9 + $0x10] sm:$0xff]  ;;  %v1886_v19 = vld [vmem:[#allocation4 + $0xc0] sm:$0xff]  ;;  %v1885_v21 = vld [vmem:[#allocation4 + $0xb8] sm:$0xff] }
 0x3fd   : > { %1903 = vmatpush.msra.mxu0 %v1874_v8  ;;  %1964 = vmatpush.msra.mxu2 %v1942_v18  ;;  %v1868_v22 = vld [vmem:[#allocation4 + $0x30] sm:$0xff]  ;;  %v1867_v24 = vld [vmem:[#allocation4 + $0x28] sm:$0xff]  ;;  %v1866_v26 = vld [vmem:[#allocation4 + $0x20] sm:$0xff] }
 0x3fe   : > { %1923 = vmatpush.msra.mxu1 %v1890_v9  ;;  %v1884_v23 = vld [vmem:[#allocation4 + $0xb0] sm:$0xff]  ;;  %v1883_v25 = vld [vmem:[#allocation4 + $0xa8] sm:$0xff]  ;;  %v1882_v27 = vld [vmem:[#allocation4 + $0xa0] sm:$0xff] }
 0x3ff   : > { %1904 = vmatpush.msra.mxu0 %v1873_v10  ;;  %v1865_v28 = vld [vmem:[#allocation4 + $0x18] sm:$0xff]  ;;  %v1864_v30 = vld [vmem:[#allocation4 + $0x10] sm:$0xff]  ;;  %v1863_v32 = vld [vmem:[#allocation4 + $0x8] sm:$0xff] }
 0x400   : > { %1924 = vmatpush.msra.mxu1 %v1889_v11  ;;  %v1881_v29 = vld [vmem:[#allocation4 + $0x98] sm:$0xff]  ;;  %v1880_v31 = vld [vmem:[#allocation4 + $0x90] sm:$0xff]  ;;  %v1879_v33 = vld [vmem:[#allocation4 + $0x88] sm:$0xff] }
 0x401   : > { %1905 = vmatpush.msra.mxu0 %v1872_v12  ;;  %v1862_v34 = vld [vmem:[#allocation4] sm:$0xff]  ;;  %v1940_v39 = vld [vmem:[%s3240_s9] sm:$0xff] }
 0x402   : > { %1925 = vmatpush.msra.mxu1 %v1888_v13  ;;  %v1878_v35 = vld [vmem:[#allocation4 + $0x80] sm:$0xff]  ;;  %v1896_v36 = vld.sshfl [vmem:[#allocation1] sm:$0xff pattern:$0x73625140] }
 0x403   : > { %1906 = vmatpush.msra.mxu0 %v1871_v14  ;;  %v1897_v37 = vld.sshfl [vmem:[#allocation1 + $0x8] sm:$0xff pattern:$0x73625140]  ;;  %v2314_v43 = vld [vmem:[%s3255_s14] ss:$0 sm:$0xff] }
 0x404   : > { %1926 = vmatpush.msra.mxu1 %v1887_v15  ;;  %v1941_v38 = vld [vmem:[%s3240_s9 + $0x8] sm:$0xff] }
 0x405   : > { %1907 = vmatpush.msra.mxu0 %v1870_v49  ;;  %1965 = vmatpush.msra.mxu2 %v1941_v38 }
 0x406   : > { %1927 = vmatpush.msra.mxu1 %v1886_v19 }
 0x407   : > { %1908 = vmatpush.msra.mxu0 %v1869_v20  ;;  %1966 = vmatpush.msra.mxu2 %v1940_v39 }
 0x408   : > { %1928 = vmatpush.msra.mxu1 %v1885_v21 }
 0x409   : > { %1909 = vmatpush.msra.mxu0 %v1868_v22 }
 0x40a   : > { %1929 = vmatpush.msra.mxu1 %v1884_v23 }
 0x40b   : > { %1910 = vmatpush.msra.mxu0 %v1867_v24 }
 0x40c   : > { %1930 = vmatpush.msra.mxu1 %v1883_v25 }
 0x40d   : > { %1911 = vmatpush.msra.mxu0 %v1866_v26 }
 0x40e   : > { %1931 = vmatpush.msra.mxu1 %v1882_v27 }
 0x40f   : > { %1912 = vmatpush.msra.mxu0 %v1865_v28 }
 0x410   : > { %1932 = vmatpush.msra.mxu1 %v1881_v29 }
 0x411   : > { %1913 = vmatpush.msra.mxu0 %v1864_v30 }
 0x412   : > { %1933 = vmatpush.msra.mxu1 %v1880_v31 }
 0x413   : > { %1914 = vmatpush.msra.mxu0 %v1863_v32 }
 0x414   : > { %1934 = vmatpush.msra.mxu1 %v1879_v33 }
 0x415   : > { %1915 = vmatpush.msra.mxu0 %v1862_v34 }
 0x416   : > { %1935 = vmatpush.msra.mxu1 %v1878_v35  ;;  %1916 = vmatmul.f32.vlgmr.msra.gmra.mxu0 %v1896_v36 }
 0x417   : > { %1936 = vmatmul.f32.vlgmr.msra.gmra.mxu1 %v1897_v37 }
 0x493   : > { %v1917_v40 = vpop.f32.mrf.mxu0 }
 0x494   : > { %v1937_v41 = vpop.f32.mrf.mxu1 }
 0x495   : > { %v1938_v42 = vadd.f32 %v1937_v41, %v1917_v40 }
 0x497   : > { %2163 = vmatmul.msk.f32.vlgmr.msra.gmra.mxu2 %vm1641_vm4, %v1938_v42 }
 0x51a   : > { %v1968_v44 = vpop.f32.mrf.mxu2 }
 0x51b   : > { %v1969_v45 = vadd.f32 %v2314_v43, %v1968_v44 }
 0x51d   : > { %1972 = vst.msk [vmem:[#allocation6] sm:$0x3] %vm1971_vm5, %v1969_v45 }
 0x51e PF: > { %s3256_s16 = sadd.s32 4294967295, %s2417_s25   ;;  %s3257_s26 = sld [smem:[#allocation15_spill]] }
 0x51f   : > { %p2225_p12 = scmp.eq.s32.totalorder %s3256_s16, 7  ;;  %s2423_s20 = smov [#allocation6]  }
 0x520   : > { %s1979_s21 = sshll.u32 %s2423_s20, 4  ;;  %s1980_s21 = int_to_ptr.vmem [resolvable:$true] %s1979_s21 }
 0x524   : > { %s1981_s19 = sshll.u32 %s3257_s26, 4  ;;  %s1982_s19 = int_to_ptr.hbm [resolvable:$true] %s1981_s19 }
 0x525   : > { %2222 = dma.vmem_to_hbm [thread:$0]  (%p2225_p12), %s1980_s21, 32, %s1982_s19, [#allocation7]  }
 0x526   : > { %2380 = dma.done.wait (%p2225_p12), [#allocation7], 32  }
 0x527   : > { %2382 = vsyncadd (%p2225_p12), [#allocation7], 4294967264 }
 0x528 PF: > { %s22_s25 = sadd.s32 1, %s2417_s25   ;;  %s3258_s21 = sld [smem:[#allocation9_spill]] }
 0x529   : > { %p19_p13 = scmp.ge.s32.totalorder %s22_s25, 10   ;;  %s3259_s0 = sld [smem:[#allocation10_spill]] }
 0x52a   : > { %s3260_s29 = sld [smem:[#allocation11_spill]]  ;;  %s3262_s17 = smov %s2389_s18 }
 0x52b   : > { %s3261_s24 = sld [smem:[#allocation12_spill]]  ;;  %s3263_s18 = smov %s2550_s15 }
 0x52c   : > { %s3264_s19 = smov %s2405_s22  ;;  %s3265_s20 = smov %s2409_s23 }
 0x52d   :  { %21 = sbr.rel (!%p19_p13) target bundleno = 9 (0x9), region = 160 }
 0x52f   : > { %s3266_s22 = smov %s3259_s0 }
 0x530   : > { %s3267_s23 = smov %s3260_s29 }
 0x532   :  { %1995 = vsyncpa [#allocation7], 1 }
 0x533   :  { %1997 = vsyncpa [#allocation7 + $0x1], 1 }

</bundles_post_ra>
